<compile_context>
chip_gen: v6e
topology: v6e:2x2x1
jax: 0.10.0
libtpu: 0.0.40
codegen_flags: <defaults>
</compile_context>

<pallas_src>
import math

import jax
import jax.numpy as jnp
from jax.experimental import pallas as pl
from jax.experimental.pallas import tpu as pltpu


_NEG_INF = -1e30            # additive-mask value; kept in f32 (not representable in bf16)
_MXU_DTYPE = jnp.bfloat16   # MXU operand dtype (f32 accumulation everywhere); use
                            # jnp.float32 here for bit-faithful parity with the reference.


# ------------------------------ fused kernel -------------------------------

def _build_hgt_kernel(ntypes, node_dict, edge_dict, metapaths, n_heads, d_k, out_dim):
    """Builds the fused HGT-layer kernel, closed over the static graph schema."""
    T = len(ntypes)
    M = len(metapaths)
    C = out_dim

    def kernel(*refs):
        alpha_ref = refs[0]                         # (T, 1, 1) f32  sigmoid(skip)
        feat_full = refs[1:1 + T]                   # (N_t, in_dim) f32   (source role)
        feat_tile = refs[1 + T:1 + 2 * T]           # (rt_t, in_dim) f32  (dst-row tile)
        p0 = 1 + 2 * T
        (kv_w_ref, kv_b_ref, q_w_ref, q_b_ref,
         a_w_ref, a_b_ref, ra_ref, rm_ref) = refs[p0:p0 + 8]
        mask_refs = refs[p0 + 8:p0 + 8 + M]         # (rt_dst, N_src) f32 additive masks
        out_refs = refs[p0 + 8 + M:]                # (rt_t, out_dim) f32

        # ---- Stage 1: stacked K|V projection (all source rows) + Q (dst tile rows).
        kv, q, xt_cache = {}, {}, {}
        for i, nt in enumerate(ntypes):
            t = node_dict[nt]
            xf = feat_full[i][...]
            xt = feat_tile[i][...]
            xt_cache[nt] = xt
            kvy = jnp.dot(xf.astype(_MXU_DTYPE), kv_w_ref[t],
                          preferred_element_type=jnp.float32) + kv_b_ref[t]
            qy = jnp.dot(xt.astype(_MXU_DTYPE), q_w_ref[t],
                         preferred_element_type=jnp.float32) + q_b_ref[t]
            kv[nt] = (kvy[:, :C].astype(_MXU_DTYPE), kvy[:, C:].astype(_MXU_DTYPE))
            q[nt] = qy.astype(_MXU_DTYPE)

        # ---- Stage 2: per-relation attention (all heads in this single invocation),
        #      accumulated per destination node type (cross_reducer='mean').
        acc = {nt: None for nt in ntypes}
        n_rel = {nt: 0 for nt in ntypes}
        for m_i, (stype, etype, dsttype) in enumerate(metapaths):
            r = edge_dict[etype]
            k_s, v_s = kv[stype]
            # Block-diagonal relation matrices transform every head in one matmul;
            # relation_pri / sqrt(d_k) is already folded into ra (host side).
            key = jnp.dot(k_s, ra_ref[r],
                          preferred_element_type=jnp.float32).astype(_MXU_DTYPE)
            val = jnp.dot(v_s, rm_ref[r],
                          preferred_element_type=jnp.float32).astype(_MXU_DTYPE)
            q_d = q[dsttype]
            amask = mask_refs[m_i][...]             # 0 / -1e30, f32 (precomputed once)
            if acc[dsttype] is None:
                acc[dsttype] = [None] * n_heads
            for h in range(n_heads):                # static unrolled, no grid overhead
                sl = slice(h * d_k, (h + 1) * d_k)
                sc = jax.lax.dot_general(
                    q_d[:, sl], key[:, sl],
                    (((1,), (1,)), ((), ())),
                    preferred_element_type=jnp.float32) + amask      # (rt_d, N_s) f32
                sc = sc - jnp.max(sc, axis=-1, keepdims=True)
                p = jnp.exp(sc)
                p = p * pl.reciprocal(jnp.sum(p, axis=-1, keepdims=True), approx=True)
                th = jnp.dot(p.astype(_MXU_DTYPE), val[:, sl],
                             preferred_element_type=jnp.float32)     # (rt_d, d_k) f32
                prev = acc[dsttype][h]
                acc[dsttype][h] = th if prev is None else prev + th
            n_rel[dsttype] += 1

        # ---- Stage 3: cross-relation mean, a_linear, skip-gated mix; lane-dense,
        #      node-major full-tile store (no post-kernel transpose/reshape).
        for i, nt in enumerate(ntypes):
            t = node_dict[nt]
            alpha = alpha_ref[t]                    # (1, 1) f32
            xt = xt_cache[nt]                       # (rt, in_dim) f32
            if acc[nt] is not None:
                inv = 1.0 / float(n_rel[nt])
                trans = a_b_ref[t]                  # (1, C) f32; broadcasts on first add
                for h in range(n_heads):
                    trans = trans + jnp.dot(
                        (acc[nt][h] * inv).astype(_MXU_DTYPE), a_w_ref[t, h],
                        preferred_element_type=jnp.float32)
            else:
                # No incoming relations: trans_out = dropout(feat_dst) == feat_dst (eval).
                trans = xt
            out_refs[i][...] = trans * alpha + xt * (1.0 - alpha)

    return kernel


# ------------------------------ host wrapper -------------------------------

def _block_diag_heads(mats, out_dim, n_heads, d_k):
    """(H, d_k, d_k) -> (out_dim, out_dim) with head h on diagonal block h."""
    z = jnp.zeros((out_dim, out_dim), jnp.float32)
    for h in range(n_heads):
        z = z.at[h * d_k:(h + 1) * d_k, h * d_k:(h + 1) * d_k].set(mats[h])
    return z


def _full_spec(arr):
    zeros = (0,) * arr.ndim
    return pl.BlockSpec(tuple(int(s) for s in arr.shape), lambda i: zeros)


def hgt_layer_forward(params, feats, metapaths, adj, node_dict, edge_dict,
                      n_heads, out_dim):
    """Whole HGT layer (eval, use_norm=False) as one fused pallas_call."""
    ntypes = list(node_dict.keys())
    T = len(ntypes)
    R = len(edge_dict)
    C = out_dim
    d_k = out_dim // n_heads
    sqrt_dk = math.sqrt(d_k)

    feat_list = [feats[nt] for nt in ntypes]
    Ns = [int(f.shape[0]) for f in feat_list]
    in_dim = int(feat_list[0].shape[1])

    # dst-row tiling: small 'parallel' grid axis so the v7x megacore can split the
    # work across both TensorCores; falls back to a single step if rows don't tile.
    grid_n = 1
    for cand in (2,):
        if all(n % cand == 0 and (n // cand) % 8 == 0 for n in Ns):
            grid_n = cand
            break
    rts = [n // grid_n for n in Ns]

    # ---- One-time parameter preprocessing (cached alongside params in a real model).
    kv_w = jnp.stack([jnp.concatenate([params["k_w"][t].T, params["v_w"][t].T], axis=1)
                      for t in range(T)]).astype(_MXU_DTYPE)              # (T, in, 2C)
    kv_b = jnp.stack([jnp.concatenate([params["k_b"][t], params["v_b"][t]], axis=0)
                      for t in range(T)]).reshape(T, 1, 2 * C)            # (T, 1, 2C) f32
    q_w = jnp.transpose(params["q_w"], (0, 2, 1)).astype(_MXU_DTYPE)      # (T, in, C)
    q_b = params["q_b"].reshape(T, 1, C)                                  # (T, 1, C) f32
    a_w = (jnp.transpose(params["a_w"], (0, 2, 1))
           .reshape(T, n_heads, d_k, C).astype(_MXU_DTYPE))               # (T, H, d_k, C)
    a_b = params["a_b"].reshape(T, 1, C)                                  # (T, 1, C) f32
    # Block-diagonal relation transforms (heads folded into the lane dim); the
    # relation_pri / sqrt(d_k) score scale is folded into relation_att.
    ra_bd = jnp.stack([
        _block_diag_heads(params["relation_att"][r]
                          * (params["relation_pri"][r] / sqrt_dk)[:, None, None],
                          C, n_heads, d_k)
        for r in range(R)]).astype(_MXU_DTYPE)                            # (R, C, C)
    rm_bd = jnp.stack([
        _block_diag_heads(params["relation_msg"][r], C, n_heads, d_k)
        for r in range(R)]).astype(_MXU_DTYPE)                            # (R, C, C)
    alpha = jax.nn.sigmoid(params["skip"]).astype(jnp.float32).reshape(T, 1, 1)
    # Additive masks (0 for edge, -1e30 otherwise), built once instead of per head.
    amasks = [jnp.where(adj[mp] > 0.5, 0.0, _NEG_INF).astype(jnp.float32)
              for mp in metapaths]

    # ---- Specs / args (order must match the kernel's ref unpacking). ----
    args = [alpha]
    in_specs = [_full_spec(alpha)]
    for f in feat_list:                                   # full rows (source role)
        args.append(f)
        in_specs.append(_full_spec(f))
    for f, rt in zip(feat_list, rts):                     # dst-row tile (dst role)
        args.append(f)
        in_specs.append(pl.BlockSpec((rt, in_dim), lambda i: (i, 0)))
    for arr in (kv_w, kv_b, q_w, q_b, a_w, a_b, ra_bd, rm_bd):
        args.append(arr)
        in_specs.append(_full_spec(arr))
    for m, mp in zip(amasks, metapaths):
        rt_d = rts[ntypes.index(mp[2])]
        args.append(m)
        in_specs.append(pl.BlockSpec((rt_d, int(m.shape[1])), lambda i: (i, 0)))

    out_shape = tuple(jax.ShapeDtypeStruct((n, C), jnp.float32) for n in Ns)
    out_specs = tuple(pl.BlockSpec((rt, C), lambda i: (i, 0)) for rt in rts)

    kernel = _build_hgt_kernel(ntypes, node_dict, edge_dict, metapaths,
                               n_heads, d_k, C)

    outs = pl.pallas_call(
        kernel,
        out_shape=out_shape,
        grid=(grid_n,),
        in_specs=in_specs,
        out_specs=out_specs,
        compiler_params=pltpu.CompilerParams(
            dimension_semantics=("parallel",),
            vmem_limit_bytes=32 * 1024 * 1024),
    )(*args)
    return {nt: o for nt, o in zip(ntypes, outs)}


# ---------------------------- pure-JAX reference ----------------------------

def hgt_layer_reference(params, feats, metapaths, adj, node_dict, edge_dict,
                        n_heads, out_dim):
    d_k = out_dim // n_heads
    sqrt_dk = math.sqrt(d_k)

    def lin(x, w, b):
        return x @ w.T + b

    K = {nt: lin(feats[nt], params["k_w"][i], params["k_b"][i]).reshape(-1, n_heads, d_k)
         for nt, i in node_dict.items()}
    V = {nt: lin(feats[nt], params["v_w"][i], params["v_b"][i]).reshape(-1, n_heads, d_k)
         for nt, i in node_dict.items()}
    Q = {nt: lin(feats[nt], params["q_w"][i], params["q_b"][i]).reshape(-1, n_heads, d_k)
         for nt, i in node_dict.items()}

    agg = {nt: [] for nt in node_dict}
    for mp in metapaths:
        s, e, d = mp
        r = edge_dict[e]
        key = jnp.einsum('nhd,hde->nhe', K[s], params["relation_att"][r])
        val = jnp.einsum('nhd,hde->nhe', V[s], params["relation_msg"][r])
        score = jnp.einsum('mhd,nhd->mnh', Q[d], key) * params["relation_pri"][r] / sqrt_dk
        score = jnp.where(adj[mp][:, :, None] > 0.5, score, -1e30)
        att = jax.nn.softmax(score, axis=1)
        t = jnp.einsum('mnh,nhe->mhe', att, val).reshape(-1, out_dim)
        agg[d].append(t)

    new_h = {}
    for nt, i in node_dict.items():
        alpha = jax.nn.sigmoid(params["skip"][i])
        if agg[nt]:
            t = jnp.mean(jnp.stack(agg[nt]), axis=0)
            trans = lin(t, params["a_w"][i], params["a_b"][i])
        else:
            trans = feats[nt]
        new_h[nt] = trans * alpha + feats[nt] * (1.0 - alpha)
    return new_h


# ----------------------------------- main -----------------------------------

if __name__ == "__main__":
    in_dim = out_dim = 32
    n_heads = 4
    d_k = out_dim // n_heads

    node_dict = {"paper": 0, "author": 1}
    edge_dict = {"writes": 0, "cites": 1, "written_by": 2}
    metapaths = [("author", "writes", "paper"),
                 ("paper", "cites", "paper"),
                 ("paper", "written_by", "author")]
    num_nodes = {"paper": 16, "author": 16}

    T = len(node_dict)
    R = len(edge_dict)

    key = jax.random.PRNGKey(0)
    keys = jax.random.split(key, 16)

    def lin_init(k, fan_in, shape):          # PyTorch nn.Linear default init
        bound = 1.0 / math.sqrt(fan_in)
        return jax.random.uniform(k, shape, jnp.float32, -bound, bound)

    def xavier(k, shape, fan_in, fan_out):   # nn.init.xavier_uniform_
        lim = math.sqrt(6.0 / (fan_in + fan_out))
        return jax.random.uniform(k, shape, jnp.float32, -lim, lim)

    params = {
        "k_w": lin_init(keys[0], in_dim, (T, out_dim, in_dim)),
        "k_b": lin_init(keys[1], in_dim, (T, out_dim)),
        "q_w": lin_init(keys[2], in_dim, (T, out_dim, in_dim)),
        "q_b": lin_init(keys[3], in_dim, (T, out_dim)),
        "v_w": lin_init(keys[4], in_dim, (T, out_dim, in_dim)),
        "v_b": lin_init(keys[5], in_dim, (T, out_dim)),
        "a_w": lin_init(keys[6], out_dim, (T, out_dim, out_dim)),
        "a_b": lin_init(keys[7], out_dim, (T, out_dim)),
        "relation_pri": jnp.ones((R, n_heads), jnp.float32),
        "relation_att": xavier(keys[8], (R, n_heads, d_k, d_k), d_k, d_k),
        "relation_msg": xavier(keys[9], (R, n_heads, d_k, d_k), d_k, d_k),
        "skip": jnp.ones((T,), jnp.float32),
    }

    feats = {
        "paper": jax.random.normal(keys[10], (num_nodes["paper"], in_dim), jnp.float32),
        "author": jax.random.normal(keys[11], (num_nodes["author"], in_dim), jnp.float32),
    }

    # Dense adjacency per canonical etype; every dst node has >= 1 incoming edge.
    adj = {}
    for i, mp in enumerate(metapaths):
        s, _, d = mp
        m = jax.random.uniform(keys[12 + i], (num_nodes[d], num_nodes[s])) > 0.5
        m = m.at[:, 0].set(True)
        adj[mp] = m.astype(jnp.float32)

    out = hgt_layer_forward(params, feats, metapaths, adj, node_dict, edge_dict,
                            n_heads, out_dim)
    out = jax.tree_util.tree_map(jax.block_until_ready, out)

    ref = hgt_layer_reference(params, feats, metapaths, adj, node_dict, edge_dict,
                              n_heads, out_dim)
    # Tolerance accounts for bf16 MXU operands in the kernel vs the f32 reference
    # (measured error is ~1e-3; 3e-2 leaves margin for softmax amplification).
    for nt in node_dict:
        assert out[nt].shape == (num_nodes[nt], out_dim)
        assert jnp.allclose(out[nt], ref[nt], atol=3e-2, rtol=3e-2), nt

    print("KERNEL_OK")
</pallas_src>

<mosaic_0001>
module attributes {stable_mosaic.version = 11 : i64} {
  func.func @kernel(%arg0: i32, %arg1: memref<2x1x1xf32, #tpu.memory_space<vmem>>, %arg2: memref<16x32xf32, #tpu.memory_space<vmem>>, %arg3: memref<16x32xf32, #tpu.memory_space<vmem>>, %arg4: memref<8x32xf32, #tpu.memory_space<vmem>>, %arg5: memref<8x32xf32, #tpu.memory_space<vmem>>, %arg6: memref<2x32x64xbf16, #tpu.memory_space<vmem>>, %arg7: memref<2x1x64xf32, #tpu.memory_space<vmem>>, %arg8: memref<2x32x32xbf16, #tpu.memory_space<vmem>>, %arg9: memref<2x1x32xf32, #tpu.memory_space<vmem>>, %arg10: memref<2x4x8x32xbf16, #tpu.memory_space<vmem>>, %arg11: memref<2x1x32xf32, #tpu.memory_space<vmem>>, %arg12: memref<3x32x32xbf16, #tpu.memory_space<vmem>>, %arg13: memref<3x32x32xbf16, #tpu.memory_space<vmem>>, %arg14: memref<8x16xf32, #tpu.memory_space<vmem>>, %arg15: memref<8x16xf32, #tpu.memory_space<vmem>>, %arg16: memref<8x16xf32, #tpu.memory_space<vmem>>, %arg17: memref<8x32xf32, #tpu.memory_space<vmem>>, %arg18: memref<8x32xf32, #tpu.memory_space<vmem>>) attributes {dimension_semantics = [#tpu.dimension_semantics<parallel>], iteration_bounds = array<i64: 2>, scalar_prefetch = 0 : i64, scratch_operands = 0 : i64, tpu.core_type = #tpu.core_type<tc>, window_params = [{pipeline_mode = #tpu.pipeline_mode<synchronous>, transform_indices = @transform_0, window_bounds = array<i64: 2, 1, 1>}, {pipeline_mode = #tpu.pipeline_mode<synchronous>, transform_indices = @transform_1, window_bounds = array<i64: 16, 32>}, {pipeline_mode = #tpu.pipeline_mode<synchronous>, transform_indices = @transform_2, window_bounds = array<i64: 16, 32>}, {transform_indices = @transform_3, window_bounds = array<i64: 8, 32>}, {transform_indices = @transform_4, window_bounds = array<i64: 8, 32>}, {pipeline_mode = #tpu.pipeline_mode<synchronous>, transform_indices = @transform_5, window_bounds = array<i64: 2, 32, 64>}, {pipeline_mode = #tpu.pipeline_mode<synchronous>, transform_indices = @transform_6, window_bounds = array<i64: 2, 1, 64>}, {pipeline_mode = #tpu.pipeline_mode<synchronous>, transform_indices = @transform_7, window_bounds = array<i64: 2, 32, 32>}, {pipeline_mode = #tpu.pipeline_mode<synchronous>, transform_indices = @transform_8, window_bounds = array<i64: 2, 1, 32>}, {pipeline_mode = #tpu.pipeline_mode<synchronous>, transform_indices = @transform_9, window_bounds = array<i64: 2, 4, 8, 32>}, {pipeline_mode = #tpu.pipeline_mode<synchronous>, transform_indices = @transform_10, window_bounds = array<i64: 2, 1, 32>}, {pipeline_mode = #tpu.pipeline_mode<synchronous>, transform_indices = @transform_11, window_bounds = array<i64: 3, 32, 32>}, {pipeline_mode = #tpu.pipeline_mode<synchronous>, transform_indices = @transform_12, window_bounds = array<i64: 3, 32, 32>}, {transform_indices = @transform_13, window_bounds = array<i64: 8, 16>}, {transform_indices = @transform_14, window_bounds = array<i64: 8, 16>}, {transform_indices = @transform_15, window_bounds = array<i64: 8, 16>}, {transform_indices = @transform_16, window_bounds = array<i64: 8, 32>}, {transform_indices = @transform_17, window_bounds = array<i64: 8, 32>}]} {
    %c0 = arith.constant 0 : index
    %c0_0 = arith.constant 0 : index
    %0 = vector.load %arg2[%c0, %c0_0] : memref<16x32xf32, #tpu.memory_space<vmem>>, vector<16x32xf32>
    %c0_1 = arith.constant 0 : index
    %c0_2 = arith.constant 0 : index
    %1 = vector.load %arg4[%c0_1, %c0_2] : memref<8x32xf32, #tpu.memory_space<vmem>>, vector<8x32xf32>
    %2 = arith.truncf %0 : vector<16x32xf32> to vector<16x32xbf16>
    %c0_3 = arith.constant 0 : index
    %c0_4 = arith.constant 0 : index
    %c0_5 = arith.constant 0 : index
    %3 = vector.load %arg6[%c0_3, %c0_4, %c0_5] : memref<2x32x64xbf16, #tpu.memory_space<vmem>>, vector<1x32x64xbf16>
    %4 = vector.shape_cast %3 : vector<1x32x64xbf16> to vector<32x64xbf16>
    %cst = arith.constant dense<0.000000e+00> : vector<16x64xf32>
    %5 = tpu.matmul %2, %4, %cst {dimension_numbers = #tpu.dot_dimension_numbers<[1], [0], [0], [1], [0, 0, 1, 1], [], []>} : vector<16x32xbf16>, vector<32x64xbf16>, vector<16x64xf32> -> vector<16x64xf32>
    %c0_6 = arith.constant 0 : index
    %c0_7 = arith.constant 0 : index
    %c0_8 = arith.constant 0 : index
    %6 = vector.load %arg7[%c0_6, %c0_7, %c0_8] : memref<2x1x64xf32, #tpu.memory_space<vmem>>, vector<1x1x64xf32>
    %7 = vector.shape_cast %6 : vector<1x1x64xf32> to vector<1x64xf32>
    %8 = vector.broadcast %7 : vector<1x64xf32> to vector<16x64xf32>
    %9 = arith.addf %5, %8 : vector<16x64xf32>
    %10 = arith.truncf %1 : vector<8x32xf32> to vector<8x32xbf16>
    %c0_9 = arith.constant 0 : index
    %c0_10 = arith.constant 0 : index
    %c0_11 = arith.constant 0 : index
    %11 = vector.load %arg8[%c0_9, %c0_10, %c0_11] : memref<2x32x32xbf16, #tpu.memory_space<vmem>>, vector<1x32x32xbf16>
    %12 = vector.shape_cast %11 : vector<1x32x32xbf16> to vector<32x32xbf16>
    %cst_12 = arith.constant dense<0.000000e+00> : vector<8x32xf32>
    %13 = tpu.matmul %10, %12, %cst_12 {dimension_numbers = #tpu.dot_dimension_numbers<[1], [0], [0], [1], [0, 0, 1, 1], [], []>} : vector<8x32xbf16>, vector<32x32xbf16>, vector<8x32xf32> -> vector<8x32xf32>
    %c0_13 = arith.constant 0 : index
    %c0_14 = arith.constant 0 : index
    %c0_15 = arith.constant 0 : index
    %14 = vector.load %arg9[%c0_13, %c0_14, %c0_15] : memref<2x1x32xf32, #tpu.memory_space<vmem>>, vector<1x1x32xf32>
    %15 = vector.shape_cast %14 : vector<1x1x32xf32> to vector<1x32xf32>
    %16 = vector.broadcast %15 : vector<1x32xf32> to vector<8x32xf32>
    %17 = arith.addf %13, %16 : vector<8x32xf32>
    %18 = vector.extract_strided_slice %9 {offsets = [0, 0], sizes = [16, 32], strides = [1, 1]} : vector<16x64xf32> to vector<16x32xf32>
    %19 = arith.truncf %18 : vector<16x32xf32> to vector<16x32xbf16>
    %20 = vector.extract_strided_slice %9 {offsets = [0, 32], sizes = [16, 32], strides = [1, 1]} : vector<16x64xf32> to vector<16x32xf32>
    %21 = arith.truncf %20 : vector<16x32xf32> to vector<16x32xbf16>
    %22 = arith.truncf %17 : vector<8x32xf32> to vector<8x32xbf16>
    %c0_16 = arith.constant 0 : index
    %c0_17 = arith.constant 0 : index
    %23 = vector.load %arg3[%c0_16, %c0_17] : memref<16x32xf32, #tpu.memory_space<vmem>>, vector<16x32xf32>
    %c0_18 = arith.constant 0 : index
    %c0_19 = arith.constant 0 : index
    %24 = vector.load %arg5[%c0_18, %c0_19] : memref<8x32xf32, #tpu.memory_space<vmem>>, vector<8x32xf32>
    %25 = arith.truncf %23 : vector<16x32xf32> to vector<16x32xbf16>
    %c1 = arith.constant 1 : index
    %c0_20 = arith.constant 0 : index
    %c0_21 = arith.constant 0 : index
    %26 = vector.load %arg6[%c1, %c0_20, %c0_21] : memref<2x32x64xbf16, #tpu.memory_space<vmem>>, vector<1x32x64xbf16>
    %27 = vector.shape_cast %26 : vector<1x32x64xbf16> to vector<32x64xbf16>
    %cst_22 = arith.constant dense<0.000000e+00> : vector<16x64xf32>
    %28 = tpu.matmul %25, %27, %cst_22 {dimension_numbers = #tpu.dot_dimension_numbers<[1], [0], [0], [1], [0, 0, 1, 1], [], []>} : vector<16x32xbf16>, vector<32x64xbf16>, vector<16x64xf32> -> vector<16x64xf32>
    %c1_23 = arith.constant 1 : index
    %c0_24 = arith.constant 0 : index
    %c0_25 = arith.constant 0 : index
    %29 = vector.load %arg7[%c1_23, %c0_24, %c0_25] : memref<2x1x64xf32, #tpu.memory_space<vmem>>, vector<1x1x64xf32>
    %30 = vector.shape_cast %29 : vector<1x1x64xf32> to vector<1x64xf32>
    %31 = vector.broadcast %30 : vector<1x64xf32> to vector<16x64xf32>
    %32 = arith.addf %28, %31 : vector<16x64xf32>
    %33 = arith.truncf %24 : vector<8x32xf32> to vector<8x32xbf16>
    %c1_26 = arith.constant 1 : index
    %c0_27 = arith.constant 0 : index
    %c0_28 = arith.constant 0 : index
    %34 = vector.load %arg8[%c1_26, %c0_27, %c0_28] : memref<2x32x32xbf16, #tpu.memory_space<vmem>>, vector<1x32x32xbf16>
    %35 = vector.shape_cast %34 : vector<1x32x32xbf16> to vector<32x32xbf16>
    %cst_29 = arith.constant dense<0.000000e+00> : vector<8x32xf32>
    %36 = tpu.matmul %33, %35, %cst_29 {dimension_numbers = #tpu.dot_dimension_numbers<[1], [0], [0], [1], [0, 0, 1, 1], [], []>} : vector<8x32xbf16>, vector<32x32xbf16>, vector<8x32xf32> -> vector<8x32xf32>
    %c1_30 = arith.constant 1 : index
    %c0_31 = arith.constant 0 : index
    %c0_32 = arith.constant 0 : index
    %37 = vector.load %arg9[%c1_30, %c0_31, %c0_32] : memref<2x1x32xf32, #tpu.memory_space<vmem>>, vector<1x1x32xf32>
    %38 = vector.shape_cast %37 : vector<1x1x32xf32> to vector<1x32xf32>
    %39 = vector.broadcast %38 : vector<1x32xf32> to vector<8x32xf32>
    %40 = arith.addf %36, %39 : vector<8x32xf32>
    %41 = vector.extract_strided_slice %32 {offsets = [0, 0], sizes = [16, 32], strides = [1, 1]} : vector<16x64xf32> to vector<16x32xf32>
    %42 = arith.truncf %41 : vector<16x32xf32> to vector<16x32xbf16>
    %43 = vector.extract_strided_slice %32 {offsets = [0, 32], sizes = [16, 32], strides = [1, 1]} : vector<16x64xf32> to vector<16x32xf32>
    %44 = arith.truncf %43 : vector<16x32xf32> to vector<16x32xbf16>
    %45 = arith.truncf %40 : vector<8x32xf32> to vector<8x32xbf16>
    %c0_33 = arith.constant 0 : index
    %c0_34 = arith.constant 0 : index
    %c0_35 = arith.constant 0 : index
    %46 = vector.load %arg12[%c0_33, %c0_34, %c0_35] : memref<3x32x32xbf16, #tpu.memory_space<vmem>>, vector<1x32x32xbf16>
    %47 = vector.shape_cast %46 : vector<1x32x32xbf16> to vector<32x32xbf16>
    %cst_36 = arith.constant dense<0.000000e+00> : vector<16x32xf32>
    %48 = tpu.matmul %42, %47, %cst_36 {dimension_numbers = #tpu.dot_dimension_numbers<[1], [0], [0], [1], [0, 0, 1, 1], [], []>} : vector<16x32xbf16>, vector<32x32xbf16>, vector<16x32xf32> -> vector<16x32xf32>
    %49 = arith.truncf %48 : vector<16x32xf32> to vector<16x32xbf16>
    %c0_37 = arith.constant 0 : index
    %c0_38 = arith.constant 0 : index
    %c0_39 = arith.constant 0 : index
    %50 = vector.load %arg13[%c0_37, %c0_38, %c0_39] : memref<3x32x32xbf16, #tpu.memory_space<vmem>>, vector<1x32x32xbf16>
    %51 = vector.shape_cast %50 : vector<1x32x32xbf16> to vector<32x32xbf16>
    %cst_40 = arith.constant dense<0.000000e+00> : vector<16x32xf32>
    %52 = tpu.matmul %44, %51, %cst_40 {dimension_numbers = #tpu.dot_dimension_numbers<[1], [0], [0], [1], [0, 0, 1, 1], [], []>} : vector<16x32xbf16>, vector<32x32xbf16>, vector<16x32xf32> -> vector<16x32xf32>
    %53 = arith.truncf %52 : vector<16x32xf32> to vector<16x32xbf16>
    %c0_41 = arith.constant 0 : index
    %c0_42 = arith.constant 0 : index
    %54 = vector.load %arg14[%c0_41, %c0_42] : memref<8x16xf32, #tpu.memory_space<vmem>>, vector<8x16xf32>
    %55 = vector.extract_strided_slice %22 {offsets = [0, 0], sizes = [8, 8], strides = [1, 1]} : vector<8x32xbf16> to vector<8x8xbf16>
    %56 = vector.extract_strided_slice %49 {offsets = [0, 0], sizes = [16, 8], strides = [1, 1]} : vector<16x32xbf16> to vector<16x8xbf16>
    %cst_43 = arith.constant dense<0.000000e+00> : vector<8x16xf32>
    %57 = tpu.matmul %55, %56, %cst_43 {dimension_numbers = #tpu.dot_dimension_numbers<[1], [1], [0], [0], [0, 0, 1, 0], [], []>} : vector<8x8xbf16>, vector<16x8xbf16>, vector<8x16xf32> -> vector<8x16xf32>
    %58 = arith.addf %57, %54 : vector<8x16xf32>
    %cst_44 = arith.constant dense<0xFF800000> : vector<8xf32>
    %59 = vector.multi_reduction <maximumf>, %58, %cst_44 [1] : vector<8x16xf32> to vector<8xf32>
    %60 = vector.shape_cast %59 : vector<8xf32> to vector<8x1xf32>
    %61 = vector.broadcast %60 : vector<8x1xf32> to vector<8x16xf32>
    %62 = arith.subf %58, %61 : vector<8x16xf32>
    %63 = math.exp %62 : vector<8x16xf32>
    %cst_45 = arith.constant dense<0.000000e+00> : vector<8xf32>
    %64 = vector.multi_reduction <add>, %63, %cst_45 [1] : vector<8x16xf32> to vector<8xf32>
    %65 = vector.shape_cast %64 : vector<8xf32> to vector<8x1xf32>
    %66 = tpu.reciprocal %65 {approx = true} : vector<8x1xf32> -> vector<8x1xf32>
    %67 = vector.broadcast %66 : vector<8x1xf32> to vector<8x16xf32>
    %68 = arith.mulf %63, %67 : vector<8x16xf32>
    %69 = arith.truncf %68 : vector<8x16xf32> to vector<8x16xbf16>
    %70 = vector.extract_strided_slice %53 {offsets = [0, 0], sizes = [16, 8], strides = [1, 1]} : vector<16x32xbf16> to vector<16x8xbf16>
    %cst_46 = arith.constant dense<0.000000e+00> : vector<8x8xf32>
    %71 = tpu.matmul %69, %70, %cst_46 {dimension_numbers = #tpu.dot_dimension_numbers<[1], [0], [0], [1], [0, 0, 1, 1], [], []>} : vector<8x16xbf16>, vector<16x8xbf16>, vector<8x8xf32> -> vector<8x8xf32>
    %72 = vector.extract_strided_slice %22 {offsets = [0, 8], sizes = [8, 8], strides = [1, 1]} : vector<8x32xbf16> to vector<8x8xbf16>
    %73 = vector.extract_strided_slice %49 {offsets = [0, 8], sizes = [16, 8], strides = [1, 1]} : vector<16x32xbf16> to vector<16x8xbf16>
    %cst_47 = arith.constant dense<0.000000e+00> : vector<8x16xf32>
    %74 = tpu.matmul %72, %73, %cst_47 {dimension_numbers = #tpu.dot_dimension_numbers<[1], [1], [0], [0], [0, 0, 1, 0], [], []>} : vector<8x8xbf16>, vector<16x8xbf16>, vector<8x16xf32> -> vector<8x16xf32>
    %75 = arith.addf %74, %54 : vector<8x16xf32>
    %cst_48 = arith.constant dense<0xFF800000> : vector<8xf32>
    %76 = vector.multi_reduction <maximumf>, %75, %cst_48 [1] : vector<8x16xf32> to vector<8xf32>
    %77 = vector.shape_cast %76 : vector<8xf32> to vector<8x1xf32>
    %78 = vector.broadcast %77 : vector<8x1xf32> to vector<8x16xf32>
    %79 = arith.subf %75, %78 : vector<8x16xf32>
    %80 = math.exp %79 : vector<8x16xf32>
    %cst_49 = arith.constant dense<0.000000e+00> : vector<8xf32>
    %81 = vector.multi_reduction <add>, %80, %cst_49 [1] : vector<8x16xf32> to vector<8xf32>
    %82 = vector.shape_cast %81 : vector<8xf32> to vector<8x1xf32>
    %83 = tpu.reciprocal %82 {approx = true} : vector<8x1xf32> -> vector<8x1xf32>
    %84 = vector.broadcast %83 : vector<8x1xf32> to vector<8x16xf32>
    %85 = arith.mulf %80, %84 : vector<8x16xf32>
    %86 = arith.truncf %85 : vector<8x16xf32> to vector<8x16xbf16>
    %87 = vector.extract_strided_slice %53 {offsets = [0, 8], sizes = [16, 8], strides = [1, 1]} : vector<16x32xbf16> to vector<16x8xbf16>
    %cst_50 = arith.constant dense<0.000000e+00> : vector<8x8xf32>
    %88 = tpu.matmul %86, %87, %cst_50 {dimension_numbers = #tpu.dot_dimension_numbers<[1], [0], [0], [1], [0, 0, 1, 1], [], []>} : vector<8x16xbf16>, vector<16x8xbf16>, vector<8x8xf32> -> vector<8x8xf32>
    %89 = vector.extract_strided_slice %22 {offsets = [0, 16], sizes = [8, 8], strides = [1, 1]} : vector<8x32xbf16> to vector<8x8xbf16>
    %90 = vector.extract_strided_slice %49 {offsets = [0, 16], sizes = [16, 8], strides = [1, 1]} : vector<16x32xbf16> to vector<16x8xbf16>
    %cst_51 = arith.constant dense<0.000000e+00> : vector<8x16xf32>
    %91 = tpu.matmul %89, %90, %cst_51 {dimension_numbers = #tpu.dot_dimension_numbers<[1], [1], [0], [0], [0, 0, 1, 0], [], []>} : vector<8x8xbf16>, vector<16x8xbf16>, vector<8x16xf32> -> vector<8x16xf32>
    %92 = arith.addf %91, %54 : vector<8x16xf32>
    %cst_52 = arith.constant dense<0xFF800000> : vector<8xf32>
    %93 = vector.multi_reduction <maximumf>, %92, %cst_52 [1] : vector<8x16xf32> to vector<8xf32>
    %94 = vector.shape_cast %93 : vector<8xf32> to vector<8x1xf32>
    %95 = vector.broadcast %94 : vector<8x1xf32> to vector<8x16xf32>
    %96 = arith.subf %92, %95 : vector<8x16xf32>
    %97 = math.exp %96 : vector<8x16xf32>
    %cst_53 = arith.constant dense<0.000000e+00> : vector<8xf32>
    %98 = vector.multi_reduction <add>, %97, %cst_53 [1] : vector<8x16xf32> to vector<8xf32>
    %99 = vector.shape_cast %98 : vector<8xf32> to vector<8x1xf32>
    %100 = tpu.reciprocal %99 {approx = true} : vector<8x1xf32> -> vector<8x1xf32>
    %101 = vector.broadcast %100 : vector<8x1xf32> to vector<8x16xf32>
    %102 = arith.mulf %97, %101 : vector<8x16xf32>
    %103 = arith.truncf %102 : vector<8x16xf32> to vector<8x16xbf16>
    %104 = vector.extract_strided_slice %53 {offsets = [0, 16], sizes = [16, 8], strides = [1, 1]} : vector<16x32xbf16> to vector<16x8xbf16>
    %cst_54 = arith.constant dense<0.000000e+00> : vector<8x8xf32>
    %105 = tpu.matmul %103, %104, %cst_54 {dimension_numbers = #tpu.dot_dimension_numbers<[1], [0], [0], [1], [0, 0, 1, 1], [], []>} : vector<8x16xbf16>, vector<16x8xbf16>, vector<8x8xf32> -> vector<8x8xf32>
    %106 = vector.extract_strided_slice %22 {offsets = [0, 24], sizes = [8, 8], strides = [1, 1]} : vector<8x32xbf16> to vector<8x8xbf16>
    %107 = vector.extract_strided_slice %49 {offsets = [0, 24], sizes = [16, 8], strides = [1, 1]} : vector<16x32xbf16> to vector<16x8xbf16>
    %cst_55 = arith.constant dense<0.000000e+00> : vector<8x16xf32>
    %108 = tpu.matmul %106, %107, %cst_55 {dimension_numbers = #tpu.dot_dimension_numbers<[1], [1], [0], [0], [0, 0, 1, 0], [], []>} : vector<8x8xbf16>, vector<16x8xbf16>, vector<8x16xf32> -> vector<8x16xf32>
    %109 = arith.addf %108, %54 : vector<8x16xf32>
    %cst_56 = arith.constant dense<0xFF800000> : vector<8xf32>
    %110 = vector.multi_reduction <maximumf>, %109, %cst_56 [1] : vector<8x16xf32> to vector<8xf32>
    %111 = vector.shape_cast %110 : vector<8xf32> to vector<8x1xf32>
    %112 = vector.broadcast %111 : vector<8x1xf32> to vector<8x16xf32>
    %113 = arith.subf %109, %112 : vector<8x16xf32>
    %114 = math.exp %113 : vector<8x16xf32>
    %cst_57 = arith.constant dense<0.000000e+00> : vector<8xf32>
    %115 = vector.multi_reduction <add>, %114, %cst_57 [1] : vector<8x16xf32> to vector<8xf32>
    %116 = vector.shape_cast %115 : vector<8xf32> to vector<8x1xf32>
    %117 = tpu.reciprocal %116 {approx = true} : vector<8x1xf32> -> vector<8x1xf32>
    %118 = vector.broadcast %117 : vector<8x1xf32> to vector<8x16xf32>
    %119 = arith.mulf %114, %118 : vector<8x16xf32>
    %120 = arith.truncf %119 : vector<8x16xf32> to vector<8x16xbf16>
    %121 = vector.extract_strided_slice %53 {offsets = [0, 24], sizes = [16, 8], strides = [1, 1]} : vector<16x32xbf16> to vector<16x8xbf16>
    %cst_58 = arith.constant dense<0.000000e+00> : vector<8x8xf32>
    %122 = tpu.matmul %120, %121, %cst_58 {dimension_numbers = #tpu.dot_dimension_numbers<[1], [0], [0], [1], [0, 0, 1, 1], [], []>} : vector<8x16xbf16>, vector<16x8xbf16>, vector<8x8xf32> -> vector<8x8xf32>
    %c1_59 = arith.constant 1 : index
    %c0_60 = arith.constant 0 : index
    %c0_61 = arith.constant 0 : index
    %123 = vector.load %arg12[%c1_59, %c0_60, %c0_61] : memref<3x32x32xbf16, #tpu.memory_space<vmem>>, vector<1x32x32xbf16>
    %124 = vector.shape_cast %123 : vector<1x32x32xbf16> to vector<32x32xbf16>
    %cst_62 = arith.constant dense<0.000000e+00> : vector<16x32xf32>
    %125 = tpu.matmul %19, %124, %cst_62 {dimension_numbers = #tpu.dot_dimension_numbers<[1], [0], [0], [1], [0, 0, 1, 1], [], []>} : vector<16x32xbf16>, vector<32x32xbf16>, vector<16x32xf32> -> vector<16x32xf32>
    %126 = arith.truncf %125 : vector<16x32xf32> to vector<16x32xbf16>
    %c1_63 = arith.constant 1 : index
    %c0_64 = arith.constant 0 : index
    %c0_65 = arith.constant 0 : index
    %127 = vector.load %arg13[%c1_63, %c0_64, %c0_65] : memref<3x32x32xbf16, #tpu.memory_space<vmem>>, vector<1x32x32xbf16>
    %128 = vector.shape_cast %127 : vector<1x32x32xbf16> to vector<32x32xbf16>
    %cst_66 = arith.constant dense<0.000000e+00> : vector<16x32xf32>
    %129 = tpu.matmul %21, %128, %cst_66 {dimension_numbers = #tpu.dot_dimension_numbers<[1], [0], [0], [1], [0, 0, 1, 1], [], []>} : vector<16x32xbf16>, vector<32x32xbf16>, vector<16x32xf32> -> vector<16x32xf32>
    %130 = arith.truncf %129 : vector<16x32xf32> to vector<16x32xbf16>
    %c0_67 = arith.constant 0 : index
    %c0_68 = arith.constant 0 : index
    %131 = vector.load %arg15[%c0_67, %c0_68] : memref<8x16xf32, #tpu.memory_space<vmem>>, vector<8x16xf32>
    %132 = vector.extract_strided_slice %22 {offsets = [0, 0], sizes = [8, 8], strides = [1, 1]} : vector<8x32xbf16> to vector<8x8xbf16>
    %133 = vector.extract_strided_slice %126 {offsets = [0, 0], sizes = [16, 8], strides = [1, 1]} : vector<16x32xbf16> to vector<16x8xbf16>
    %cst_69 = arith.constant dense<0.000000e+00> : vector<8x16xf32>
    %134 = tpu.matmul %132, %133, %cst_69 {dimension_numbers = #tpu.dot_dimension_numbers<[1], [1], [0], [0], [0, 0, 1, 0], [], []>} : vector<8x8xbf16>, vector<16x8xbf16>, vector<8x16xf32> -> vector<8x16xf32>
    %135 = arith.addf %134, %131 : vector<8x16xf32>
    %cst_70 = arith.constant dense<0xFF800000> : vector<8xf32>
    %136 = vector.multi_reduction <maximumf>, %135, %cst_70 [1] : vector<8x16xf32> to vector<8xf32>
    %137 = vector.shape_cast %136 : vector<8xf32> to vector<8x1xf32>
    %138 = vector.broadcast %137 : vector<8x1xf32> to vector<8x16xf32>
    %139 = arith.subf %135, %138 : vector<8x16xf32>
    %140 = math.exp %139 : vector<8x16xf32>
    %cst_71 = arith.constant dense<0.000000e+00> : vector<8xf32>
    %141 = vector.multi_reduction <add>, %140, %cst_71 [1] : vector<8x16xf32> to vector<8xf32>
    %142 = vector.shape_cast %141 : vector<8xf32> to vector<8x1xf32>
    %143 = tpu.reciprocal %142 {approx = true} : vector<8x1xf32> -> vector<8x1xf32>
    %144 = vector.broadcast %143 : vector<8x1xf32> to vector<8x16xf32>
    %145 = arith.mulf %140, %144 : vector<8x16xf32>
    %146 = arith.truncf %145 : vector<8x16xf32> to vector<8x16xbf16>
    %147 = vector.extract_strided_slice %130 {offsets = [0, 0], sizes = [16, 8], strides = [1, 1]} : vector<16x32xbf16> to vector<16x8xbf16>
    %cst_72 = arith.constant dense<0.000000e+00> : vector<8x8xf32>
    %148 = tpu.matmul %146, %147, %cst_72 {dimension_numbers = #tpu.dot_dimension_numbers<[1], [0], [0], [1], [0, 0, 1, 1], [], []>} : vector<8x16xbf16>, vector<16x8xbf16>, vector<8x8xf32> -> vector<8x8xf32>
    %149 = arith.addf %71, %148 : vector<8x8xf32>
    %150 = vector.extract_strided_slice %22 {offsets = [0, 8], sizes = [8, 8], strides = [1, 1]} : vector<8x32xbf16> to vector<8x8xbf16>
    %151 = vector.extract_strided_slice %126 {offsets = [0, 8], sizes = [16, 8], strides = [1, 1]} : vector<16x32xbf16> to vector<16x8xbf16>
    %cst_73 = arith.constant dense<0.000000e+00> : vector<8x16xf32>
    %152 = tpu.matmul %150, %151, %cst_73 {dimension_numbers = #tpu.dot_dimension_numbers<[1], [1], [0], [0], [0, 0, 1, 0], [], []>} : vector<8x8xbf16>, vector<16x8xbf16>, vector<8x16xf32> -> vector<8x16xf32>
    %153 = arith.addf %152, %131 : vector<8x16xf32>
    %cst_74 = arith.constant dense<0xFF800000> : vector<8xf32>
    %154 = vector.multi_reduction <maximumf>, %153, %cst_74 [1] : vector<8x16xf32> to vector<8xf32>
    %155 = vector.shape_cast %154 : vector<8xf32> to vector<8x1xf32>
    %156 = vector.broadcast %155 : vector<8x1xf32> to vector<8x16xf32>
    %157 = arith.subf %153, %156 : vector<8x16xf32>
    %158 = math.exp %157 : vector<8x16xf32>
    %cst_75 = arith.constant dense<0.000000e+00> : vector<8xf32>
    %159 = vector.multi_reduction <add>, %158, %cst_75 [1] : vector<8x16xf32> to vector<8xf32>
    %160 = vector.shape_cast %159 : vector<8xf32> to vector<8x1xf32>
    %161 = tpu.reciprocal %160 {approx = true} : vector<8x1xf32> -> vector<8x1xf32>
    %162 = vector.broadcast %161 : vector<8x1xf32> to vector<8x16xf32>
    %163 = arith.mulf %158, %162 : vector<8x16xf32>
    %164 = arith.truncf %163 : vector<8x16xf32> to vector<8x16xbf16>
    %165 = vector.extract_strided_slice %130 {offsets = [0, 8], sizes = [16, 8], strides = [1, 1]} : vector<16x32xbf16> to vector<16x8xbf16>
    %cst_76 = arith.constant dense<0.000000e+00> : vector<8x8xf32>
    %166 = tpu.matmul %164, %165, %cst_76 {dimension_numbers = #tpu.dot_dimension_numbers<[1], [0], [0], [1], [0, 0, 1, 1], [], []>} : vector<8x16xbf16>, vector<16x8xbf16>, vector<8x8xf32> -> vector<8x8xf32>
    %167 = arith.addf %88, %166 : vector<8x8xf32>
    %168 = vector.extract_strided_slice %22 {offsets = [0, 16], sizes = [8, 8], strides = [1, 1]} : vector<8x32xbf16> to vector<8x8xbf16>
    %169 = vector.extract_strided_slice %126 {offsets = [0, 16], sizes = [16, 8], strides = [1, 1]} : vector<16x32xbf16> to vector<16x8xbf16>
    %cst_77 = arith.constant dense<0.000000e+00> : vector<8x16xf32>
    %170 = tpu.matmul %168, %169, %cst_77 {dimension_numbers = #tpu.dot_dimension_numbers<[1], [1], [0], [0], [0, 0, 1, 0], [], []>} : vector<8x8xbf16>, vector<16x8xbf16>, vector<8x16xf32> -> vector<8x16xf32>
    %171 = arith.addf %170, %131 : vector<8x16xf32>
    %cst_78 = arith.constant dense<0xFF800000> : vector<8xf32>
    %172 = vector.multi_reduction <maximumf>, %171, %cst_78 [1] : vector<8x16xf32> to vector<8xf32>
    %173 = vector.shape_cast %172 : vector<8xf32> to vector<8x1xf32>
    %174 = vector.broadcast %173 : vector<8x1xf32> to vector<8x16xf32>
    %175 = arith.subf %171, %174 : vector<8x16xf32>
    %176 = math.exp %175 : vector<8x16xf32>
    %cst_79 = arith.constant dense<0.000000e+00> : vector<8xf32>
    %177 = vector.multi_reduction <add>, %176, %cst_79 [1] : vector<8x16xf32> to vector<8xf32>
    %178 = vector.shape_cast %177 : vector<8xf32> to vector<8x1xf32>
    %179 = tpu.reciprocal %178 {approx = true} : vector<8x1xf32> -> vector<8x1xf32>
    %180 = vector.broadcast %179 : vector<8x1xf32> to vector<8x16xf32>
    %181 = arith.mulf %176, %180 : vector<8x16xf32>
    %182 = arith.truncf %181 : vector<8x16xf32> to vector<8x16xbf16>
    %183 = vector.extract_strided_slice %130 {offsets = [0, 16], sizes = [16, 8], strides = [1, 1]} : vector<16x32xbf16> to vector<16x8xbf16>
    %cst_80 = arith.constant dense<0.000000e+00> : vector<8x8xf32>
    %184 = tpu.matmul %182, %183, %cst_80 {dimension_numbers = #tpu.dot_dimension_numbers<[1], [0], [0], [1], [0, 0, 1, 1], [], []>} : vector<8x16xbf16>, vector<16x8xbf16>, vector<8x8xf32> -> vector<8x8xf32>
    %185 = arith.addf %105, %184 : vector<8x8xf32>
    %186 = vector.extract_strided_slice %22 {offsets = [0, 24], sizes = [8, 8], strides = [1, 1]} : vector<8x32xbf16> to vector<8x8xbf16>
    %187 = vector.extract_strided_slice %126 {offsets = [0, 24], sizes = [16, 8], strides = [1, 1]} : vector<16x32xbf16> to vector<16x8xbf16>
    %cst_81 = arith.constant dense<0.000000e+00> : vector<8x16xf32>
    %188 = tpu.matmul %186, %187, %cst_81 {dimension_numbers = #tpu.dot_dimension_numbers<[1], [1], [0], [0], [0, 0, 1, 0], [], []>} : vector<8x8xbf16>, vector<16x8xbf16>, vector<8x16xf32> -> vector<8x16xf32>
    %189 = arith.addf %188, %131 : vector<8x16xf32>
    %cst_82 = arith.constant dense<0xFF800000> : vector<8xf32>
    %190 = vector.multi_reduction <maximumf>, %189, %cst_82 [1] : vector<8x16xf32> to vector<8xf32>
    %191 = vector.shape_cast %190 : vector<8xf32> to vector<8x1xf32>
    %192 = vector.broadcast %191 : vector<8x1xf32> to vector<8x16xf32>
    %193 = arith.subf %189, %192 : vector<8x16xf32>
    %194 = math.exp %193 : vector<8x16xf32>
    %cst_83 = arith.constant dense<0.000000e+00> : vector<8xf32>
    %195 = vector.multi_reduction <add>, %194, %cst_83 [1] : vector<8x16xf32> to vector<8xf32>
    %196 = vector.shape_cast %195 : vector<8xf32> to vector<8x1xf32>
    %197 = tpu.reciprocal %196 {approx = true} : vector<8x1xf32> -> vector<8x1xf32>
    %198 = vector.broadcast %197 : vector<8x1xf32> to vector<8x16xf32>
    %199 = arith.mulf %194, %198 : vector<8x16xf32>
    %200 = arith.truncf %199 : vector<8x16xf32> to vector<8x16xbf16>
    %201 = vector.extract_strided_slice %130 {offsets = [0, 24], sizes = [16, 8], strides = [1, 1]} : vector<16x32xbf16> to vector<16x8xbf16>
    %cst_84 = arith.constant dense<0.000000e+00> : vector<8x8xf32>
    %202 = tpu.matmul %200, %201, %cst_84 {dimension_numbers = #tpu.dot_dimension_numbers<[1], [0], [0], [1], [0, 0, 1, 1], [], []>} : vector<8x16xbf16>, vector<16x8xbf16>, vector<8x8xf32> -> vector<8x8xf32>
    %203 = arith.addf %122, %202 : vector<8x8xf32>
    %c2 = arith.constant 2 : index
    %c0_85 = arith.constant 0 : index
    %c0_86 = arith.constant 0 : index
    %204 = vector.load %arg12[%c2, %c0_85, %c0_86] : memref<3x32x32xbf16, #tpu.memory_space<vmem>>, vector<1x32x32xbf16>
    %205 = vector.shape_cast %204 : vector<1x32x32xbf16> to vector<32x32xbf16>
    %cst_87 = arith.constant dense<0.000000e+00> : vector<16x32xf32>
    %206 = tpu.matmul %19, %205, %cst_87 {dimension_numbers = #tpu.dot_dimension_numbers<[1], [0], [0], [1], [0, 0, 1, 1], [], []>} : vector<16x32xbf16>, vector<32x32xbf16>, vector<16x32xf32> -> vector<16x32xf32>
    %207 = arith.truncf %206 : vector<16x32xf32> to vector<16x32xbf16>
    %c2_88 = arith.constant 2 : index
    %c0_89 = arith.constant 0 : index
    %c0_90 = arith.constant 0 : index
    %208 = vector.load %arg13[%c2_88, %c0_89, %c0_90] : memref<3x32x32xbf16, #tpu.memory_space<vmem>>, vector<1x32x32xbf16>
    %209 = vector.shape_cast %208 : vector<1x32x32xbf16> to vector<32x32xbf16>
    %cst_91 = arith.constant dense<0.000000e+00> : vector<16x32xf32>
    %210 = tpu.matmul %21, %209, %cst_91 {dimension_numbers = #tpu.dot_dimension_numbers<[1], [0], [0], [1], [0, 0, 1, 1], [], []>} : vector<16x32xbf16>, vector<32x32xbf16>, vector<16x32xf32> -> vector<16x32xf32>
    %211 = arith.truncf %210 : vector<16x32xf32> to vector<16x32xbf16>
    %c0_92 = arith.constant 0 : index
    %c0_93 = arith.constant 0 : index
    %212 = vector.load %arg16[%c0_92, %c0_93] : memref<8x16xf32, #tpu.memory_space<vmem>>, vector<8x16xf32>
    %213 = vector.extract_strided_slice %45 {offsets = [0, 0], sizes = [8, 8], strides = [1, 1]} : vector<8x32xbf16> to vector<8x8xbf16>
    %214 = vector.extract_strided_slice %207 {offsets = [0, 0], sizes = [16, 8], strides = [1, 1]} : vector<16x32xbf16> to vector<16x8xbf16>
    %cst_94 = arith.constant dense<0.000000e+00> : vector<8x16xf32>
    %215 = tpu.matmul %213, %214, %cst_94 {dimension_numbers = #tpu.dot_dimension_numbers<[1], [1], [0], [0], [0, 0, 1, 0], [], []>} : vector<8x8xbf16>, vector<16x8xbf16>, vector<8x16xf32> -> vector<8x16xf32>
    %216 = arith.addf %215, %212 : vector<8x16xf32>
    %cst_95 = arith.constant dense<0xFF800000> : vector<8xf32>
    %217 = vector.multi_reduction <maximumf>, %216, %cst_95 [1] : vector<8x16xf32> to vector<8xf32>
    %218 = vector.shape_cast %217 : vector<8xf32> to vector<8x1xf32>
    %219 = vector.broadcast %218 : vector<8x1xf32> to vector<8x16xf32>
    %220 = arith.subf %216, %219 : vector<8x16xf32>
    %221 = math.exp %220 : vector<8x16xf32>
    %cst_96 = arith.constant dense<0.000000e+00> : vector<8xf32>
    %222 = vector.multi_reduction <add>, %221, %cst_96 [1] : vector<8x16xf32> to vector<8xf32>
    %223 = vector.shape_cast %222 : vector<8xf32> to vector<8x1xf32>
    %224 = tpu.reciprocal %223 {approx = true} : vector<8x1xf32> -> vector<8x1xf32>
    %225 = vector.broadcast %224 : vector<8x1xf32> to vector<8x16xf32>
    %226 = arith.mulf %221, %225 : vector<8x16xf32>
    %227 = arith.truncf %226 : vector<8x16xf32> to vector<8x16xbf16>
    %228 = vector.extract_strided_slice %211 {offsets = [0, 0], sizes = [16, 8], strides = [1, 1]} : vector<16x32xbf16> to vector<16x8xbf16>
    %cst_97 = arith.constant dense<0.000000e+00> : vector<8x8xf32>
    %229 = tpu.matmul %227, %228, %cst_97 {dimension_numbers = #tpu.dot_dimension_numbers<[1], [0], [0], [1], [0, 0, 1, 1], [], []>} : vector<8x16xbf16>, vector<16x8xbf16>, vector<8x8xf32> -> vector<8x8xf32>
    %230 = vector.extract_strided_slice %45 {offsets = [0, 8], sizes = [8, 8], strides = [1, 1]} : vector<8x32xbf16> to vector<8x8xbf16>
    %231 = vector.extract_strided_slice %207 {offsets = [0, 8], sizes = [16, 8], strides = [1, 1]} : vector<16x32xbf16> to vector<16x8xbf16>
    %cst_98 = arith.constant dense<0.000000e+00> : vector<8x16xf32>
    %232 = tpu.matmul %230, %231, %cst_98 {dimension_numbers = #tpu.dot_dimension_numbers<[1], [1], [0], [0], [0, 0, 1, 0], [], []>} : vector<8x8xbf16>, vector<16x8xbf16>, vector<8x16xf32> -> vector<8x16xf32>
    %233 = arith.addf %232, %212 : vector<8x16xf32>
    %cst_99 = arith.constant dense<0xFF800000> : vector<8xf32>
    %234 = vector.multi_reduction <maximumf>, %233, %cst_99 [1] : vector<8x16xf32> to vector<8xf32>
    %235 = vector.shape_cast %234 : vector<8xf32> to vector<8x1xf32>
    %236 = vector.broadcast %235 : vector<8x1xf32> to vector<8x16xf32>
    %237 = arith.subf %233, %236 : vector<8x16xf32>
    %238 = math.exp %237 : vector<8x16xf32>
    %cst_100 = arith.constant dense<0.000000e+00> : vector<8xf32>
    %239 = vector.multi_reduction <add>, %238, %cst_100 [1] : vector<8x16xf32> to vector<8xf32>
    %240 = vector.shape_cast %239 : vector<8xf32> to vector<8x1xf32>
    %241 = tpu.reciprocal %240 {approx = true} : vector<8x1xf32> -> vector<8x1xf32>
    %242 = vector.broadcast %241 : vector<8x1xf32> to vector<8x16xf32>
    %243 = arith.mulf %238, %242 : vector<8x16xf32>
    %244 = arith.truncf %243 : vector<8x16xf32> to vector<8x16xbf16>
    %245 = vector.extract_strided_slice %211 {offsets = [0, 8], sizes = [16, 8], strides = [1, 1]} : vector<16x32xbf16> to vector<16x8xbf16>
    %cst_101 = arith.constant dense<0.000000e+00> : vector<8x8xf32>
    %246 = tpu.matmul %244, %245, %cst_101 {dimension_numbers = #tpu.dot_dimension_numbers<[1], [0], [0], [1], [0, 0, 1, 1], [], []>} : vector<8x16xbf16>, vector<16x8xbf16>, vector<8x8xf32> -> vector<8x8xf32>
    %247 = vector.extract_strided_slice %45 {offsets = [0, 16], sizes = [8, 8], strides = [1, 1]} : vector<8x32xbf16> to vector<8x8xbf16>
    %248 = vector.extract_strided_slice %207 {offsets = [0, 16], sizes = [16, 8], strides = [1, 1]} : vector<16x32xbf16> to vector<16x8xbf16>
    %cst_102 = arith.constant dense<0.000000e+00> : vector<8x16xf32>
    %249 = tpu.matmul %247, %248, %cst_102 {dimension_numbers = #tpu.dot_dimension_numbers<[1], [1], [0], [0], [0, 0, 1, 0], [], []>} : vector<8x8xbf16>, vector<16x8xbf16>, vector<8x16xf32> -> vector<8x16xf32>
    %250 = arith.addf %249, %212 : vector<8x16xf32>
    %cst_103 = arith.constant dense<0xFF800000> : vector<8xf32>
    %251 = vector.multi_reduction <maximumf>, %250, %cst_103 [1] : vector<8x16xf32> to vector<8xf32>
    %252 = vector.shape_cast %251 : vector<8xf32> to vector<8x1xf32>
    %253 = vector.broadcast %252 : vector<8x1xf32> to vector<8x16xf32>
    %254 = arith.subf %250, %253 : vector<8x16xf32>
    %255 = math.exp %254 : vector<8x16xf32>
    %cst_104 = arith.constant dense<0.000000e+00> : vector<8xf32>
    %256 = vector.multi_reduction <add>, %255, %cst_104 [1] : vector<8x16xf32> to vector<8xf32>
    %257 = vector.shape_cast %256 : vector<8xf32> to vector<8x1xf32>
    %258 = tpu.reciprocal %257 {approx = true} : vector<8x1xf32> -> vector<8x1xf32>
    %259 = vector.broadcast %258 : vector<8x1xf32> to vector<8x16xf32>
    %260 = arith.mulf %255, %259 : vector<8x16xf32>
    %261 = arith.truncf %260 : vector<8x16xf32> to vector<8x16xbf16>
    %262 = vector.extract_strided_slice %211 {offsets = [0, 16], sizes = [16, 8], strides = [1, 1]} : vector<16x32xbf16> to vector<16x8xbf16>
    %cst_105 = arith.constant dense<0.000000e+00> : vector<8x8xf32>
    %263 = tpu.matmul %261, %262, %cst_105 {dimension_numbers = #tpu.dot_dimension_numbers<[1], [0], [0], [1], [0, 0, 1, 1], [], []>} : vector<8x16xbf16>, vector<16x8xbf16>, vector<8x8xf32> -> vector<8x8xf32>
    %264 = vector.extract_strided_slice %45 {offsets = [0, 24], sizes = [8, 8], strides = [1, 1]} : vector<8x32xbf16> to vector<8x8xbf16>
    %265 = vector.extract_strided_slice %207 {offsets = [0, 24], sizes = [16, 8], strides = [1, 1]} : vector<16x32xbf16> to vector<16x8xbf16>
    %cst_106 = arith.constant dense<0.000000e+00> : vector<8x16xf32>
    %266 = tpu.matmul %264, %265, %cst_106 {dimension_numbers = #tpu.dot_dimension_numbers<[1], [1], [0], [0], [0, 0, 1, 0], [], []>} : vector<8x8xbf16>, vector<16x8xbf16>, vector<8x16xf32> -> vector<8x16xf32>
    %267 = arith.addf %266, %212 : vector<8x16xf32>
    %cst_107 = arith.constant dense<0xFF800000> : vector<8xf32>
    %268 = vector.multi_reduction <maximumf>, %267, %cst_107 [1] : vector<8x16xf32> to vector<8xf32>
    %269 = vector.shape_cast %268 : vector<8xf32> to vector<8x1xf32>
    %270 = vector.broadcast %269 : vector<8x1xf32> to vector<8x16xf32>
    %271 = arith.subf %267, %270 : vector<8x16xf32>
    %272 = math.exp %271 : vector<8x16xf32>
    %cst_108 = arith.constant dense<0.000000e+00> : vector<8xf32>
    %273 = vector.multi_reduction <add>, %272, %cst_108 [1] : vector<8x16xf32> to vector<8xf32>
    %274 = vector.shape_cast %273 : vector<8xf32> to vector<8x1xf32>
    %275 = tpu.reciprocal %274 {approx = true} : vector<8x1xf32> -> vector<8x1xf32>
    %276 = vector.broadcast %275 : vector<8x1xf32> to vector<8x16xf32>
    %277 = arith.mulf %272, %276 : vector<8x16xf32>
    %278 = arith.truncf %277 : vector<8x16xf32> to vector<8x16xbf16>
    %279 = vector.extract_strided_slice %211 {offsets = [0, 24], sizes = [16, 8], strides = [1, 1]} : vector<16x32xbf16> to vector<16x8xbf16>
    %cst_109 = arith.constant dense<0.000000e+00> : vector<8x8xf32>
    %280 = tpu.matmul %278, %279, %cst_109 {dimension_numbers = #tpu.dot_dimension_numbers<[1], [0], [0], [1], [0, 0, 1, 1], [], []>} : vector<8x16xbf16>, vector<16x8xbf16>, vector<8x8xf32> -> vector<8x8xf32>
    %c0_110 = arith.constant 0 : index
    %c0_111 = arith.constant 0 : index
    %c0_112 = arith.constant 0 : index
    %281 = vector.load %arg1[%c0_110, %c0_111, %c0_112] : memref<2x1x1xf32, #tpu.memory_space<vmem>>, vector<1x1x1xf32>
    %282 = vector.shape_cast %281 : vector<1x1x1xf32> to vector<1x1xf32>
    %c0_113 = arith.constant 0 : index
    %c0_114 = arith.constant 0 : index
    %c0_115 = arith.constant 0 : index
    %283 = vector.load %arg11[%c0_113, %c0_114, %c0_115] : memref<2x1x32xf32, #tpu.memory_space<vmem>>, vector<1x1x32xf32>
    %284 = vector.shape_cast %283 : vector<1x1x32xf32> to vector<1x32xf32>
    %cst_116 = arith.constant 5.000000e-01 : f32
    %285 = vector.broadcast %cst_116 : f32 to vector<8x8xf32>
    %286 = arith.mulf %149, %285 : vector<8x8xf32>
    %287 = arith.truncf %286 : vector<8x8xf32> to vector<8x8xbf16>
    %c0_117 = arith.constant 0 : index
    %c0_118 = arith.constant 0 : index
    %c0_119 = arith.constant 0 : index
    %c0_120 = arith.constant 0 : index
    %288 = vector.load %arg10[%c0_117, %c0_118, %c0_119, %c0_120] : memref<2x4x8x32xbf16, #tpu.memory_space<vmem>>, vector<1x1x8x32xbf16>
    %289 = vector.shape_cast %288 : vector<1x1x8x32xbf16> to vector<8x32xbf16>
    %cst_121 = arith.constant dense<0.000000e+00> : vector<8x32xf32>
    %290 = tpu.matmul %287, %289, %cst_121 {dimension_numbers = #tpu.dot_dimension_numbers<[1], [0], [0], [1], [0, 0, 1, 1], [], []>} : vector<8x8xbf16>, vector<8x32xbf16>, vector<8x32xf32> -> vector<8x32xf32>
    %291 = vector.broadcast %284 : vector<1x32xf32> to vector<8x32xf32>
    %292 = arith.addf %291, %290 : vector<8x32xf32>
    %cst_122 = arith.constant 5.000000e-01 : f32
    %293 = vector.broadcast %cst_122 : f32 to vector<8x8xf32>
    %294 = arith.mulf %167, %293 : vector<8x8xf32>
    %295 = arith.truncf %294 : vector<8x8xf32> to vector<8x8xbf16>
    %c0_123 = arith.constant 0 : index
    %c1_124 = arith.constant 1 : index
    %c0_125 = arith.constant 0 : index
    %c0_126 = arith.constant 0 : index
    %296 = vector.load %arg10[%c0_123, %c1_124, %c0_125, %c0_126] : memref<2x4x8x32xbf16, #tpu.memory_space<vmem>>, vector<1x1x8x32xbf16>
    %297 = vector.shape_cast %296 : vector<1x1x8x32xbf16> to vector<8x32xbf16>
    %cst_127 = arith.constant dense<0.000000e+00> : vector<8x32xf32>
    %298 = tpu.matmul %295, %297, %cst_127 {dimension_numbers = #tpu.dot_dimension_numbers<[1], [0], [0], [1], [0, 0, 1, 1], [], []>} : vector<8x8xbf16>, vector<8x32xbf16>, vector<8x32xf32> -> vector<8x32xf32>
    %299 = arith.addf %292, %298 : vector<8x32xf32>
    %cst_128 = arith.constant 5.000000e-01 : f32
    %300 = vector.broadcast %cst_128 : f32 to vector<8x8xf32>
    %301 = arith.mulf %185, %300 : vector<8x8xf32>
    %302 = arith.truncf %301 : vector<8x8xf32> to vector<8x8xbf16>
    %c0_129 = arith.constant 0 : index
    %c2_130 = arith.constant 2 : index
    %c0_131 = arith.constant 0 : index
    %c0_132 = arith.constant 0 : index
    %303 = vector.load %arg10[%c0_129, %c2_130, %c0_131, %c0_132] : memref<2x4x8x32xbf16, #tpu.memory_space<vmem>>, vector<1x1x8x32xbf16>
    %304 = vector.shape_cast %303 : vector<1x1x8x32xbf16> to vector<8x32xbf16>
    %cst_133 = arith.constant dense<0.000000e+00> : vector<8x32xf32>
    %305 = tpu.matmul %302, %304, %cst_133 {dimension_numbers = #tpu.dot_dimension_numbers<[1], [0], [0], [1], [0, 0, 1, 1], [], []>} : vector<8x8xbf16>, vector<8x32xbf16>, vector<8x32xf32> -> vector<8x32xf32>
    %306 = arith.addf %299, %305 : vector<8x32xf32>
    %cst_134 = arith.constant 5.000000e-01 : f32
    %307 = vector.broadcast %cst_134 : f32 to vector<8x8xf32>
    %308 = arith.mulf %203, %307 : vector<8x8xf32>
    %309 = arith.truncf %308 : vector<8x8xf32> to vector<8x8xbf16>
    %c0_135 = arith.constant 0 : index
    %c3 = arith.constant 3 : index
    %c0_136 = arith.constant 0 : index
    %c0_137 = arith.constant 0 : index
    %310 = vector.load %arg10[%c0_135, %c3, %c0_136, %c0_137] : memref<2x4x8x32xbf16, #tpu.memory_space<vmem>>, vector<1x1x8x32xbf16>
    %311 = vector.shape_cast %310 : vector<1x1x8x32xbf16> to vector<8x32xbf16>
    %cst_138 = arith.constant dense<0.000000e+00> : vector<8x32xf32>
    %312 = tpu.matmul %309, %311, %cst_138 {dimension_numbers = #tpu.dot_dimension_numbers<[1], [0], [0], [1], [0, 0, 1, 1], [], []>} : vector<8x8xbf16>, vector<8x32xbf16>, vector<8x32xf32> -> vector<8x32xf32>
    %313 = arith.addf %306, %312 : vector<8x32xf32>
    %314 = vector.broadcast %282 : vector<1x1xf32> to vector<8x32xf32>
    %315 = arith.mulf %313, %314 : vector<8x32xf32>
    %cst_139 = arith.constant 1.000000e+00 : f32
    %316 = vector.broadcast %cst_139 : f32 to vector<1x1xf32>
    %317 = arith.subf %316, %282 : vector<1x1xf32>
    %318 = vector.broadcast %317 : vector<1x1xf32> to vector<8x32xf32>
    %319 = arith.mulf %1, %318 : vector<8x32xf32>
    %320 = arith.addf %315, %319 : vector<8x32xf32>
    %c0_140 = arith.constant 0 : index
    %c0_141 = arith.constant 0 : index
    %321 = vector.load %arg17[%c0_140, %c0_141] : memref<8x32xf32, #tpu.memory_space<vmem>>, vector<8x32xf32>
    tpu.vector_store %arg17[%c0_140, %c0_141], %320 {strides = array<i32>} : memref<8x32xf32, #tpu.memory_space<vmem>>, vector<8x32xf32>,
    %c1_142 = arith.constant 1 : index
    %c0_143 = arith.constant 0 : index
    %c0_144 = arith.constant 0 : index
    %322 = vector.load %arg1[%c1_142, %c0_143, %c0_144] : memref<2x1x1xf32, #tpu.memory_space<vmem>>, vector<1x1x1xf32>
    %323 = vector.shape_cast %322 : vector<1x1x1xf32> to vector<1x1xf32>
    %c1_145 = arith.constant 1 : index
    %c0_146 = arith.constant 0 : index
    %c0_147 = arith.constant 0 : index
    %324 = vector.load %arg11[%c1_145, %c0_146, %c0_147] : memref<2x1x32xf32, #tpu.memory_space<vmem>>, vector<1x1x32xf32>
    %325 = vector.shape_cast %324 : vector<1x1x32xf32> to vector<1x32xf32>
    %cst_148 = arith.constant 1.000000e+00 : f32
    %326 = vector.broadcast %cst_148 : f32 to vector<8x8xf32>
    %327 = arith.mulf %229, %326 : vector<8x8xf32>
    %328 = arith.truncf %327 : vector<8x8xf32> to vector<8x8xbf16>
    %c1_149 = arith.constant 1 : index
    %c0_150 = arith.constant 0 : index
    %c0_151 = arith.constant 0 : index
    %c0_152 = arith.constant 0 : index
    %329 = vector.load %arg10[%c1_149, %c0_150, %c0_151, %c0_152] : memref<2x4x8x32xbf16, #tpu.memory_space<vmem>>, vector<1x1x8x32xbf16>
    %330 = vector.shape_cast %329 : vector<1x1x8x32xbf16> to vector<8x32xbf16>
    %cst_153 = arith.constant dense<0.000000e+00> : vector<8x32xf32>
    %331 = tpu.matmul %328, %330, %cst_153 {dimension_numbers = #tpu.dot_dimension_numbers<[1], [0], [0], [1], [0, 0, 1, 1], [], []>} : vector<8x8xbf16>, vector<8x32xbf16>, vector<8x32xf32> -> vector<8x32xf32>
    %332 = vector.broadcast %325 : vector<1x32xf32> to vector<8x32xf32>
    %333 = arith.addf %332, %331 : vector<8x32xf32>
    %cst_154 = arith.constant 1.000000e+00 : f32
    %334 = vector.broadcast %cst_154 : f32 to vector<8x8xf32>
    %335 = arith.mulf %246, %334 : vector<8x8xf32>
    %336 = arith.truncf %335 : vector<8x8xf32> to vector<8x8xbf16>
    %c1_155 = arith.constant 1 : index
    %c1_156 = arith.constant 1 : index
    %c0_157 = arith.constant 0 : index
    %c0_158 = arith.constant 0 : index
    %337 = vector.load %arg10[%c1_155, %c1_156, %c0_157, %c0_158] : memref<2x4x8x32xbf16, #tpu.memory_space<vmem>>, vector<1x1x8x32xbf16>
    %338 = vector.shape_cast %337 : vector<1x1x8x32xbf16> to vector<8x32xbf16>
    %cst_159 = arith.constant dense<0.000000e+00> : vector<8x32xf32>
    %339 = tpu.matmul %336, %338, %cst_159 {dimension_numbers = #tpu.dot_dimension_numbers<[1], [0], [0], [1], [0, 0, 1, 1], [], []>} : vector<8x8xbf16>, vector<8x32xbf16>, vector<8x32xf32> -> vector<8x32xf32>
    %340 = arith.addf %333, %339 : vector<8x32xf32>
    %cst_160 = arith.constant 1.000000e+00 : f32
    %341 = vector.broadcast %cst_160 : f32 to vector<8x8xf32>
    %342 = arith.mulf %263, %341 : vector<8x8xf32>
    %343 = arith.truncf %342 : vector<8x8xf32> to vector<8x8xbf16>
    %c1_161 = arith.constant 1 : index
    %c2_162 = arith.constant 2 : index
    %c0_163 = arith.constant 0 : index
    %c0_164 = arith.constant 0 : index
    %344 = vector.load %arg10[%c1_161, %c2_162, %c0_163, %c0_164] : memref<2x4x8x32xbf16, #tpu.memory_space<vmem>>, vector<1x1x8x32xbf16>
    %345 = vector.shape_cast %344 : vector<1x1x8x32xbf16> to vector<8x32xbf16>
    %cst_165 = arith.constant dense<0.000000e+00> : vector<8x32xf32>
    %346 = tpu.matmul %343, %345, %cst_165 {dimension_numbers = #tpu.dot_dimension_numbers<[1], [0], [0], [1], [0, 0, 1, 1], [], []>} : vector<8x8xbf16>, vector<8x32xbf16>, vector<8x32xf32> -> vector<8x32xf32>
    %347 = arith.addf %340, %346 : vector<8x32xf32>
    %cst_166 = arith.constant 1.000000e+00 : f32
    %348 = vector.broadcast %cst_166 : f32 to vector<8x8xf32>
    %349 = arith.mulf %280, %348 : vector<8x8xf32>
    %350 = arith.truncf %349 : vector<8x8xf32> to vector<8x8xbf16>
    %c1_167 = arith.constant 1 : index
    %c3_168 = arith.constant 3 : index
    %c0_169 = arith.constant 0 : index
    %c0_170 = arith.constant 0 : index
    %351 = vector.load %arg10[%c1_167, %c3_168, %c0_169, %c0_170] : memref<2x4x8x32xbf16, #tpu.memory_space<vmem>>, vector<1x1x8x32xbf16>
    %352 = vector.shape_cast %351 : vector<1x1x8x32xbf16> to vector<8x32xbf16>
    %cst_171 = arith.constant dense<0.000000e+00> : vector<8x32xf32>
    %353 = tpu.matmul %350, %352, %cst_171 {dimension_numbers = #tpu.dot_dimension_numbers<[1], [0], [0], [1], [0, 0, 1, 1], [], []>} : vector<8x8xbf16>, vector<8x32xbf16>, vector<8x32xf32> -> vector<8x32xf32>
    %354 = arith.addf %347, %353 : vector<8x32xf32>
    %355 = vector.broadcast %323 : vector<1x1xf32> to vector<8x32xf32>
    %356 = arith.mulf %354, %355 : vector<8x32xf32>
    %cst_172 = arith.constant 1.000000e+00 : f32
    %357 = vector.broadcast %cst_172 : f32 to vector<1x1xf32>
    %358 = arith.subf %357, %323 : vector<1x1xf32>
    %359 = vector.broadcast %358 : vector<1x1xf32> to vector<8x32xf32>
    %360 = arith.mulf %24, %359 : vector<8x32xf32>
    %361 = arith.addf %356, %360 : vector<8x32xf32>
    %c0_173 = arith.constant 0 : index
    %c0_174 = arith.constant 0 : index
    %362 = vector.load %arg18[%c0_173, %c0_174] : memref<8x32xf32, #tpu.memory_space<vmem>>, vector<8x32xf32>
    tpu.vector_store %arg18[%c0_173, %c0_174], %361 {strides = array<i32>} : memref<8x32xf32, #tpu.memory_space<vmem>>, vector<8x32xf32>,
    return
  }
  func.func @transform_0(%arg0: i32) -> (i32, i32, i32) {
    %c0_i32 = arith.constant 0 : i32
    %c0_i32_0 = arith.constant 0 : i32
    %c0_i32_1 = arith.constant 0 : i32
    %c0_i32_2 = arith.constant 0 : i32
    return %c0_i32, %c0_i32_0, %c0_i32_1 : i32, i32, i32
  }
  func.func @transform_1(%arg0: i32) -> (i32, i32) {
    %c0_i32 = arith.constant 0 : i32
    %c0_i32_0 = arith.constant 0 : i32
    %c0_i32_1 = arith.constant 0 : i32
    return %c0_i32, %c0_i32_0 : i32, i32
  }
  func.func @transform_2(%arg0: i32) -> (i32, i32) {
    %c0_i32 = arith.constant 0 : i32
    %c0_i32_0 = arith.constant 0 : i32
    %c0_i32_1 = arith.constant 0 : i32
    return %c0_i32, %c0_i32_0 : i32, i32
  }
  func.func @transform_3(%arg0: i32) -> (i32, i32) {
    %c0_i32 = arith.constant 0 : i32
    %c0_i32_0 = arith.constant 0 : i32
    return %arg0, %c0_i32 : i32, i32
  }
  func.func @transform_4(%arg0: i32) -> (i32, i32) {
    %c0_i32 = arith.constant 0 : i32
    %c0_i32_0 = arith.constant 0 : i32
    return %arg0, %c0_i32 : i32, i32
  }
  func.func @transform_5(%arg0: i32) -> (i32, i32, i32) {
    %c0_i32 = arith.constant 0 : i32
    %c0_i32_0 = arith.constant 0 : i32
    %c0_i32_1 = arith.constant 0 : i32
    %c0_i32_2 = arith.constant 0 : i32
    return %c0_i32, %c0_i32_0, %c0_i32_1 : i32, i32, i32
  }
  func.func @transform_6(%arg0: i32) -> (i32, i32, i32) {
    %c0_i32 = arith.constant 0 : i32
    %c0_i32_0 = arith.constant 0 : i32
    %c0_i32_1 = arith.constant 0 : i32
    %c0_i32_2 = arith.constant 0 : i32
    return %c0_i32, %c0_i32_0, %c0_i32_1 : i32, i32, i32
  }
  func.func @transform_7(%arg0: i32) -> (i32, i32, i32) {
    %c0_i32 = arith.constant 0 : i32
    %c0_i32_0 = arith.constant 0 : i32
    %c0_i32_1 = arith.constant 0 : i32
    %c0_i32_2 = arith.constant 0 : i32
    return %c0_i32, %c0_i32_0, %c0_i32_1 : i32, i32, i32
  }
  func.func @transform_8(%arg0: i32) -> (i32, i32, i32) {
    %c0_i32 = arith.constant 0 : i32
    %c0_i32_0 = arith.constant 0 : i32
    %c0_i32_1 = arith.constant 0 : i32
    %c0_i32_2 = arith.constant 0 : i32
    return %c0_i32, %c0_i32_0, %c0_i32_1 : i32, i32, i32
  }
  func.func @transform_9(%arg0: i32) -> (i32, i32, i32, i32) {
    %c0_i32 = arith.constant 0 : i32
    %c0_i32_0 = arith.constant 0 : i32
    %c0_i32_1 = arith.constant 0 : i32
    %c0_i32_2 = arith.constant 0 : i32
    %c0_i32_3 = arith.constant 0 : i32
    return %c0_i32, %c0_i32_0, %c0_i32_1, %c0_i32_2 : i32, i32, i32, i32
  }
  func.func @transform_10(%arg0: i32) -> (i32, i32, i32) {
    %c0_i32 = arith.constant 0 : i32
    %c0_i32_0 = arith.constant 0 : i32
    %c0_i32_1 = arith.constant 0 : i32
    %c0_i32_2 = arith.constant 0 : i32
    return %c0_i32, %c0_i32_0, %c0_i32_1 : i32, i32, i32
  }
  func.func @transform_11(%arg0: i32) -> (i32, i32, i32) {
    %c0_i32 = arith.constant 0 : i32
    %c0_i32_0 = arith.constant 0 : i32
    %c0_i32_1 = arith.constant 0 : i32
    %c0_i32_2 = arith.constant 0 : i32
    return %c0_i32, %c0_i32_0, %c0_i32_1 : i32, i32, i32
  }
  func.func @transform_12(%arg0: i32) -> (i32, i32, i32) {
    %c0_i32 = arith.constant 0 : i32
    %c0_i32_0 = arith.constant 0 : i32
    %c0_i32_1 = arith.constant 0 : i32
    %c0_i32_2 = arith.constant 0 : i32
    return %c0_i32, %c0_i32_0, %c0_i32_1 : i32, i32, i32
  }
  func.func @transform_13(%arg0: i32) -> (i32, i32) {
    %c0_i32 = arith.constant 0 : i32
    %c0_i32_0 = arith.constant 0 : i32
    return %arg0, %c0_i32 : i32, i32
  }
  func.func @transform_14(%arg0: i32) -> (i32, i32) {
    %c0_i32 = arith.constant 0 : i32
    %c0_i32_0 = arith.constant 0 : i32
    return %arg0, %c0_i32 : i32, i32
  }
  func.func @transform_15(%arg0: i32) -> (i32, i32) {
    %c0_i32 = arith.constant 0 : i32
    %c0_i32_0 = arith.constant 0 : i32
    return %arg0, %c0_i32 : i32, i32
  }
  func.func @transform_16(%arg0: i32) -> (i32, i32) {
    %c0_i32 = arith.constant 0 : i32
    %c0_i32_0 = arith.constant 0 : i32
    return %arg0, %c0_i32 : i32, i32
  }
  func.func @transform_17(%arg0: i32) -> (i32, i32) {
    %c0_i32 = arith.constant 0 : i32
    %c0_i32_0 = arith.constant 0 : i32
    return %arg0, %c0_i32 : i32, i32
  }
}

</mosaic_0001>

<bundles_post_ra>
// kernel: tpu_custom_call.1
= control target key start
LH: loop header
LB: loop body
LE: loop exit
PB: predicated region body
PF: predicated region fallthrough
CT: control target
= control target key end

     0   :  { %s5460_s0 = inlined_call_operand.vmem [shape: f32[2,1,1], index: 0, kind: input, shape index: {}]   ;;  %s5461_s1 = inlined_call_operand.hbm [shape: f32[16,32], index: 1, kind: input, shape index: {}]   ;;  %s5462_s2 = inlined_call_operand.hbm [shape: f32[16,32], index: 2, kind: input, shape index: {}]   ;;  %s5463_s3 = inlined_call_operand.hbm [shape: f32[16,32], index: 3, kind: input, shape index: {}]   ;;  %s5464_s4 = inlined_call_operand.hbm [shape: f32[16,32], index: 4, kind: input, shape index: {}]   ;;  %s5465_s5 = inlined_call_operand.hbm [shape: bf16[2,32,64], index: 5, kind: input, shape index: {}]   ;;  %s5466_s6 = inlined_call_operand.vmem [shape: f32[2,1,64], index: 6, kind: input, shape index: {}]   ;;  %s5467_s7 = inlined_call_operand.hbm [shape: bf16[2,32,32], index: 7, kind: input, shape index: {}]   ;;  %s5468_s8 = inlined_call_operand.vmem [shape: f32[2,1,32], index: 8, kind: input, shape index: {}]   ;;  %s5469_s9 = inlined_call_operand.hbm [shape: bf16[2,4,8,32], index: 9, kind: input, shape index: {}]   ;;  %s5470_s10 = inlined_call_operand.vmem [shape: f32[2,1,32], index: 10, kind: input, shape index: {}]   ;;  %s5471_s11 = inlined_call_operand.hbm [shape: bf16[3,32,32], index: 11, kind: input, shape index: {}]   ;;  %s5472_s12 = inlined_call_operand.hbm [shape: bf16[3,32,32], index: 12, kind: input, shape index: {}]   ;;  %s5473_s13 = inlined_call_operand.vmem [shape: f32[16,16], index: 13, kind: input, shape index: {}]   ;;  %s5474_s14 = inlined_call_operand.hbm [shape: f32[16,16], index: 14, kind: input, shape index: {}]   ;;  %s5475_s15 = inlined_call_operand.hbm [shape: f32[16,16], index: 15, kind: input, shape index: {}]   ;;  %s5476_s16 = inlined_call_operand.hbm [shape: f32[16,32], index: 16, kind: output, shape index: {0}]   ;;  %s5477_s17 = inlined_call_operand.hbm [shape: f32[16,32], index: 17, kind: output, shape index: {1}]  }
   0x1   :  { %5503 = sst [smem:[#allocation37_spill]] %s5460_s0 }
   0x2   :  { %5504 = sst [smem:[#allocation38_spill]] %s5461_s1 }
   0x3   :  { %5505 = sst [smem:[#allocation39_spill]] %s5462_s2 }
   0x4   :  { %5506 = sst [smem:[#allocation40_spill]] %s5463_s3 }
   0x5   :  { %5507 = sst [smem:[#allocation41_spill]] %s5465_s5 }
   0x6   :  { %5508 = sst [smem:[#allocation42_spill]] %s5466_s6 }
   0x7   :  { %5509 = sst [smem:[#allocation43_spill]] %s5467_s7 }
   0x8   :  { %5510 = sst [smem:[#allocation44_spill]] %s5468_s8 }
   0x9   :  { %5511 = sst [smem:[#allocation45_spill]] %s5470_s10 }
   0xa   :  { %5512 = sst [smem:[#allocation46_spill]] %s5471_s11 }
   0xb   :  { %5513 = sst [smem:[#allocation47_spill]] %s5473_s13 }
   0xc   :  { %5514 = sst [smem:[#allocation48_spill]] %s5476_s16 }
   0xd   :  { %5515 = sst [smem:[#allocation49_spill]] %s5477_s17 }
   0xe   :  { %23 = vsyncpa [#allocation3], 0 }
   0xf   :  { %24 = vsyncpa [#allocation6], 0 }
  0x10   :  { %25 = vsyncpa [#allocation11], 0 }
  0x11   :  { %26 = vsyncpa [#allocation14], 0 }
  0x12   :  { %27 = vsyncpa [#allocation17], 0 }
  0x13   :  { %29 = vsyncpa [#allocation17 + $0x1], 0 }
  0x14   :  { %30 = vsyncpa [#allocation4], 0 }
  0x15   :  { %32 = vsyncpa [#allocation4 + $0x1], 0 }
  0x16   :  { %33 = vsyncpa [#allocation21], 0 }
  0x17   :  { %35 = vsyncpa [#allocation21 + $0x1], 0  ;;  %s4690_s24 = smov 0   ;;  %s4692_s25 = smov 0  }
  0x18   :  { %s4694_s26 = smov 0   ;;  %s4696_s27 = smov 0  }
  0x19 LB: > { %5516 = sst [smem:[#allocation31_spill]] %s4562_s24  ;;  %s4576_s28 = smov [#allocation2]   ;;  %s4574_s27 = sphi %s4696_s27, %s5570_s27   ;;  %s4570_s26 = sphi %s4694_s26, %s5572_s26   ;;  %s4566_s25 = sphi %s4692_s25, %s5574_s25   ;;  %s4562_s24 = sphi %s4690_s24, %s5573_s24  }
  0x1a   : > { %5517 = sst [smem:[#allocation32_spill]] %s4570_s26  ;;  %s474_s29 = sshll.u32 %s4576_s28, 4  ;;  %s475_s29 = int_to_ptr.vmem [resolvable:$true] %s474_s29 }
  0x1b   : > { %s4711_s0 = sadd.s32 4294967295, %s4574_s27   ;;  %p3466_p0 = scmp.ge.s32.totalorder %s4574_s27, 1 }
  0x1c   : > { %p5482_p1 = scmp.eq.s32.totalorder %s4711_s0, 0  ;;  %p459_p2 = scmp.lt.s32.totalorder %s4574_s27, 3 }
  0x1d   : > { %s4577_s18 = smov [#allocation5]   ;;  %s4578_s20 = smov [#allocation10]  }
  0x1e   : > { %p4716_p3 = pnand %p3466_p0, %p459_p2  ;;  %s487_s19 = sshll.u32 %s4577_s18, 4  ;;  %s488_s19 = int_to_ptr.vmem [resolvable:$true] %s487_s19 }
  0x1f   : > { %s516_s21 = sshll.u32 %s4578_s20, 4  ;;  %s4173_s23 = scalar_lea.vmem %s475_s29, 256  ;;  %s517_s21 = int_to_ptr.vmem [resolvable:$true] %s516_s21 }
  0x20   : > { %s5518_s30 = scalar_select %p4716_p3, 1, 0 }
  0x21   : > { %p3982_p5 = pneg %p4716_p3  ;;  %p4174_p8 = scmp.ne.s32.totalorder %s475_s29, %s4173_s23 }
  0x22   : > { %p4181_p11 = scmp.lt.s32.totalorder %s475_s29, %s475_s29  ;;  %p4182_p12 = scmp.lt.s32.totalorder %s4173_s23, %s4173_s23 }
  0x23   : > { %p4725_p6 = pnand %p3982_p5, %p5482_p1 }
  0x24   : > { %p4183_p13 = por %p4182_p12, %p4181_p11 }
  0x25   : > { %s5519_s1 = scalar_select %p4725_p6, 1, 0 }
  0x26   : > { %p4731_p7 = pneg %p4725_p6 }
  0x28   : > { %s5520_s22 = scalar_select %p4731_p7, 1, 0 }
  0x29   : > { %p4176_p9 = pnand %p4174_p8, %p4731_p7 }
  0x2b   : > { %p4177_p10 = pneg %p4176_p9 }
  0x2d   : > { %p4184_p0 = pnand %p4183_p13, %p4177_p10 }
  0x2f   : > { %4187 = shalt.err (!%p4184_p0)
}
  0x30   : > { %s4579_s28 = smov 128   ;;  %s4580_s18 = smov 8  }
  0x31   : > { %s5521_s16 = sld [smem:[#allocation38_spill]]  ;;  %s4199_s10 = scalar_lea.vmem %s488_s19, 256 }
  0x32   : > { %p4200_p2 = scmp.ne.s32.totalorder %s488_s19, %s4199_s10  ;;  %p4207_p9 = scmp.lt.s32.totalorder %s488_s19, %s488_s19 }
  0x33   : > { %p4208_p4 = scmp.lt.s32.totalorder %s4199_s10, %s4199_s10 }
  0x34   : > { %p4202_p5 = pnand %p4200_p2, %p4731_p7 }
  0x35   : > { %p4209_p1 = por %p4208_p4, %p4207_p9 }
  0x36   : > { %p4203_p8 = pneg %p4202_p5 }
  0x37   : > { %3985 = dma.hbm_to_vmem [thread:$0]  (!%p4725_p6), %s5521_s16, 256, %s475_s29, [#allocation3], %s4579_s28, %s4579_s28, %s4580_s18  }
  0x38   : > { %p4210_p11 = pnand %p4209_p1, %p4203_p8 }
  0x3a   : > { %4213 = shalt.err (!%p4210_p11)
}
  0x3b   : > { %s5522_s2 = sld [smem:[#allocation39_spill]]  ;;  %s4225_s17 = scalar_lea.vmem %s517_s21, 512 }
  0x3c   : > { %p4226_p10 = scmp.ne.s32.totalorder %s517_s21, %s4225_s17  ;;  %p4233_p0 = scmp.lt.s32.totalorder %s517_s21, %s517_s21 }
  0x3d   : > { %p4234_p2 = scmp.lt.s32.totalorder %s4225_s17, %s4225_s17 }
  0x3e   : > { %p4228_p12 = pnand %p4226_p10, %p4731_p7 }
  0x3f   : > { %p4235_p5 = por %p4234_p2, %p4233_p0 }
  0x40   : > { %p4229_p13 = pneg %p4228_p12 }
  0x41   : > { %3988 = dma.hbm_to_vmem [thread:$0]  (!%p4725_p6), %s5522_s2, 256, %s488_s19, [#allocation6], %s4579_s28, %s4579_s28, %s4580_s18  }
  0x42   : > { %p4236_p3 = pnand %p4235_p5, %p4229_p13 }
  0x44   : > { %4239 = shalt.err (!%p4236_p3)
}
  0x45   : > { %s5484_s10 = smov 64   ;;  %s5486_s16 = smov 4  }
  0x46   : > { %s5523_s7 = sld [smem:[#allocation43_spill]]  ;;  %s4583_s19 = smov [#allocation13]  }
  0x47   : > { %s548_s28 = sshll.u32 %s4583_s19, 4  ;;  %s549_s28 = int_to_ptr.vmem [resolvable:$true] %s548_s28 }
  0x48   : > { %s4251_s18 = scalar_lea.vmem %s549_s28, 768  ;;  %p4259_p8 = scmp.lt.s32.totalorder %s549_s28, %s549_s28 }
  0x49   : > { %p4252_p1 = scmp.ne.s32.totalorder %s549_s28, %s4251_s18  ;;  %p4260_p9 = scmp.lt.s32.totalorder %s4251_s18, %s4251_s18 }
  0x4b   : > { %p4254_p4 = pnand %p4252_p1, %p4731_p7  ;;  %p4261_p11 = por %p4260_p9, %p4259_p8 }
  0x4c   : > { %3994 = dma.hbm_to_vmem [thread:$0]  (!%p4725_p6), %s5523_s7, 512, %s517_s21, [#allocation11], %s5484_s10, %s5484_s10, %s5486_s16  }
  0x4d   : > { %p4255_p3 = pneg %p4254_p4 }
  0x4f   : > { %p4262_p10 = pnand %p4261_p11, %p4255_p3 }
  0x51   : > { %4265 = shalt.err (!%p4262_p10)
}
  0x52   : > { %s5524_s11 = sld [smem:[#allocation46_spill]]  ;;  %s3465_s23 = sadd.s32 4294967294, %s4574_s27  }
  0x53   : > { %s4771_s17 = sadd.s32 1, %s4574_s27   ;;  %s111_s29 = sadd.s32 1, %s4570_s26 }
  0x54   : > { %5525 = sst [smem:[#allocation33_spill]] %s4771_s17  ;;  %s108_s13 = ssub.s32 %s4574_s27, %s4771_s17 }
  0x55   : > { %p109_p12 = scmp.eq.s32.totalorder %s108_s13, 0  ;;  %p118_p13 = scmp.ne.s32.totalorder %s4570_s26, %s4566_s25 }
  0x56   : > { %p119_p0 = scmp.eq.s32.totalorder %s4574_s27, 0  ;;  %p124_p2 = scmp.ne.s32.totalorder %s4566_s25, %s4562_s24 }
  0x57   : > { %s4782_s19 = scalar_select %p109_p12, %s4570_s26, %s111_s29  }
  0x58   : > { %4000 = dma.hbm_to_vmem [thread:$0]  (!%p4725_p6), %s5524_s11, 768, %s549_s28, [#allocation14], %s5484_s10, %s5484_s10, %s5486_s16  }
  0x59   : > { %5526 = sst [smem:[#allocation34_spill]] %s4782_s19  ;;  %p4784_p5 = por %p119_p0, %p118_p13 }
  0x5a   : > { %p5528_p1 = scmp.eq.s32.totalorder %s4711_s0, 0  ;;  %p420_p3 = scmp.eq.s32.totalorder %s4711_s0, 1 }
  0x5b   : > { %p426_p8 = scmp.eq.s32.totalorder %s3465_s23, 1  ;;  %p4031_p9 = scmp.lt.s32.totalorder %s4574_s27, 2 }
  0x5c   : > { %p4790_p4 = por %p5528_p1, %p124_p2  ;;  %p4797_p11 = por %p420_p3, %p118_p13 }
  0x5d   : > { %p4801_p10 = por %p426_p8, %p124_p2  ;;  %s577_s29 = sand.u32 1, %s4570_s26  }
  0x5e   : > { %s5529_s28 = scalar_select %p4790_p4, 1, 0 }
  0x5f   : > { %s5530_s21 = scalar_select %p4797_p11, 1, 0 }
  0x60   : > { %s5532_s13 = scalar_select %p4801_p10, 1, 0 }
  0x61   : > { %5531 = sst [smem:[#allocation35_spill]] %s5530_s21  ;;  %s4806_s10 = sshll.u32 %s577_s29, 3 }
  0x62   : > { %5533 = sst [smem:[#allocation36_spill]] %s5532_s13  ;;  %s4809_s16 = sshll.u32 %s4574_s27, 7 }
  0x63   : > { %s5534_s3 = sld [smem:[#allocation40_spill]]  ;;  %s579_s20 = scalar_lea.vmem [#allocation7], %s4806_s10 }
  0x64   : > { %s586_s11 = sshll.u32 %s579_s20, 4  ;;  %p4820_p12 = pnand %p4031_p9, %p4784_p5  ;;  %s587_s11 = int_to_ptr.vmem [resolvable:$true] %s586_s11 }
  0x65   : > { %s5536_s29 = sand.u32 1, %s4574_s27  }
  0x66   : > { %s4826_s26 = scalar_lea.sflag [#allocation3], %s5536_s29  ;;  %p4832_p0 = pneg %p4820_p12 }
  0x69   : > { %s4815_s23 = scalar_lea.hbm %s5534_s3, %s4809_s16  ;;  %s4271_s20 = scalar_lea.hbm %s5534_s3, 256 }
  0x6a   : > { %s4266_s17 = scalar_lea.hbm %s4815_s23, 128  ;;  %p4272_p5 = scmp.lt.s32.totalorder %s4815_s23, %s5534_s3 }
  0x6b   : > { %p4267_p13 = scmp.ne.s32.totalorder %s4815_s23, %s4266_s17  ;;  %p4273_p3 = scmp.lt.s32.totalorder %s4271_s20, %s4266_s17 }
  0x6d   : > { %p4269_p2 = pnand %p4832_p0, %p4267_p13  ;;  %p4274_p8 = por %p4273_p3, %p4272_p5 }
  0x6f   : > { %p4270_p1 = pneg %p4269_p2 }
  0x71   : > { %p4275_p9 = pnand %p4274_p8, %p4270_p1 }
  0x73   : > { %4278 = shalt.err (!%p4275_p9)
}
  0x74   : > { %s4279_s29 = scalar_lea.vmem %s587_s11, 128  ;;  %s4584_s21 = smov [#allocation7]  }
  0x75   : > { %p4280_p10 = scmp.ne.s32.totalorder %s587_s11, %s4279_s29  ;;  %s4284_s8 = sshll.u32 %s4584_s21, 4  ;;  %s4285_s8 = int_to_ptr.vmem [resolvable:$false] %s4284_s8 }
  0x76   : > { %s4286_s6 = scalar_lea.vmem %s4285_s8, 256  ;;  %p4287_p13 = scmp.lt.s32.totalorder %s587_s11, %s4285_s8 }
  0x77   : > { %p4282_p11 = pnand %p4280_p10, %p4832_p0  ;;  %p4288_p2 = scmp.lt.s32.totalorder %s4286_s6, %s4279_s29 }
  0x79   : > { %p4283_p4 = pneg %p4282_p11  ;;  %p4289_p6 = por %p4288_p2, %p4287_p13 }
  0x7b   : > { %p4290_p7 = pnand %p4289_p6, %p4283_p4 }
  0x7d   : > { %4293 = shalt.err (!%p4290_p7)
}
  0x7e   : > { %4007 = dma.hbm_to_vmem [thread:$0]  (!%p4820_p12), %s4815_s23, 128, %s587_s11, %s4826_s26  }
  0x7f   : > { %s4855_s21 = scalar_lea.hbm %s5474_s14, %s4809_s16  ;;  %s622_s6 = scalar_lea.vmem [#allocation16], %s4806_s10 }
  0x80   : > { %s629_s8 = sshll.u32 %s622_s6, 4  ;;  %s5538_s13 = sand.u32 1, %s4574_s27   ;;  %s630_s8 = int_to_ptr.vmem [resolvable:$true] %s629_s8 }
  0x81   : > { %s4860_s7 = scalar_lea.sflag [#allocation17], %s5538_s13  ;;  %s4294_s18 = scalar_lea.hbm %s4855_s21, 128 }
  0x82   : > { %p4295_p6 = scmp.ne.s32.totalorder %s4855_s21, %s4294_s18  ;;  %s4299_s20 = scalar_lea.hbm %s5474_s14, 256 }
  0x83   : > { %p4300_p11 = scmp.lt.s32.totalorder %s4855_s21, %s5474_s14  ;;  %p4301_p10 = scmp.lt.s32.totalorder %s4299_s20, %s4294_s18 }
  0x84   : > { %p4297_p7 = pnand %p4295_p6, %p4832_p0 }
  0x85   : > { %p4302_p1 = por %p4301_p10, %p4300_p11 }
  0x86   : > { %p4298_p4 = pneg %p4297_p7 }
  0x88   : > { %p4303_p5 = pnand %p4302_p1, %p4298_p4 }
  0x8a   : > { %4306 = shalt.err (!%p4303_p5)
}
  0x8b   : > { %s4307_s17 = scalar_lea.vmem %s630_s8, 128  ;;  %s4585_s6 = smov [#allocation16]  }
  0x8c   : > { %p4308_p3 = scmp.ne.s32.totalorder %s630_s8, %s4307_s17  ;;  %s4312_s13 = sshll.u32 %s4585_s6, 4  ;;  %s4313_s13 = int_to_ptr.vmem [resolvable:$false] %s4312_s13 }
  0x8d   : > { %s4314_s3 = scalar_lea.vmem %s4313_s13, 256  ;;  %p4315_p13 = scmp.lt.s32.totalorder %s630_s8, %s4313_s13 }
  0x8e   : > { %p4310_p8 = pnand %p4308_p3, %p4832_p0  ;;  %p4316_p2 = scmp.lt.s32.totalorder %s4314_s3, %s4307_s17 }
  0x90   : > { %p4311_p9 = pneg %p4310_p8  ;;  %p4317_p6 = por %p4316_p2, %p4315_p13 }
  0x92   : > { %p4318_p7 = pnand %p4317_p6, %p4311_p9 }
  0x94   : > { %4321 = shalt.err (!%p4318_p7)
}
  0x95   : > { %4013 = dma.hbm_to_vmem [thread:$0]  (!%p4820_p12), %s4855_s21, 128, %s630_s8, %s4860_s7  }
  0x96   : > { %s4586_s18 = smov [#allocation9]   ;;  %s4587_s23 = smov [#allocation12]  }
  0x97   : > { %s500_s11 = sshll.u32 %s4586_s18, 4  ;;  %s532_s20 = sshll.u32 %s4587_s23, 4  ;;  %s501_s11 = int_to_ptr.vmem [resolvable:$true] %s500_s11  ;;  %s533_s20 = int_to_ptr.vmem [resolvable:$true] %s532_s20 }
  0x98   : > { %s4333_s29 = scalar_lea.vmem %s501_s11, 512  ;;  %p5539_p11 = scmp.ne.s32.totalorder %s5520_s22, 0 }
  0x99   : > { %p4334_p4 = scmp.ne.s32.totalorder %s501_s11, %s4333_s29  ;;  %p4341_p5 = scmp.lt.s32.totalorder %s501_s11, %s501_s11 }
  0x9a   : > { %p4342_p3 = scmp.lt.s32.totalorder %s4333_s29, %s4333_s29 }
  0x9b   : > { %p4336_p10 = pnand %p4334_p4, %p5539_p11 }
  0x9c   : > { %p4343_p8 = por %p4342_p3, %p4341_p5 }
  0x9d   : > { %p4337_p1 = pneg %p4336_p10 }
  0x9f   : > { %p4344_p9 = pnand %p4343_p8, %p4337_p1 }
  0xa1   : > { %4347 = shalt.err (!%p4344_p9)
}
  0xa2   : > { %p5540_p13 = scmp.ne.s32.totalorder %s5519_s1, 0  ;;  %s5541_s3 = smov 4  }
  0xa3   : > { %s5542_s24 = smov 64   ;;  %s5543_s5 = sld [smem:[#allocation41_spill]] }
  0xa4   : > { %s4359_s17 = scalar_lea.vmem %s533_s20, 512  ;;  %p4367_p4 = scmp.lt.s32.totalorder %s533_s20, %s533_s20 }
  0xa5   : > { %p4360_p2 = scmp.ne.s32.totalorder %s533_s20, %s4359_s17  ;;  %p4368_p10 = scmp.lt.s32.totalorder %s4359_s17, %s4359_s17 }
  0xa7   : > { %p4362_p6 = pnand %p4360_p2, %p5539_p11  ;;  %p4369_p1 = por %p4368_p10, %p4367_p4 }
  0xa9   : > { %3991 = dma.hbm_to_vmem [thread:$0]  (!%p5540_p13), %s5543_s5, 512, %s501_s11, [#allocation6], %s5542_s24, %s5542_s24, %s5541_s3  }
  0xaa   : > { %p4363_p7 = pneg %p4362_p6 }
  0xac   : > { %p4370_p5 = pnand %p4369_p1, %p4363_p7 }
  0xae   : > { %4373 = shalt.err (!%p4370_p5)
}
  0xaf   : > { %3997 = dma.hbm_to_vmem [thread:$0]  (!%p5540_p13), %s5469_s9, 512, %s533_s20, [#allocation11], %s5542_s24, %s5542_s24, %s5541_s3  }
  0xb0   : > { %s4588_s18 = smov [#allocation15]   ;;  %s4903_s21 = scalar_lea.hbm %s5464_s4, %s4809_s16 }
  0xb1   : > { %s561_s11 = sshll.u32 %s4588_s18, 4  ;;  %s562_s11 = int_to_ptr.vmem [resolvable:$true] %s561_s11 }
  0xb2   : > { %s4385_s8 = scalar_lea.vmem %s562_s11, 768  ;;  %p4393_p2 = scmp.lt.s32.totalorder %s562_s11, %s562_s11 }
  0xb3   : > { %p4386_p3 = scmp.ne.s32.totalorder %s562_s11, %s4385_s8  ;;  %p4394_p6 = scmp.lt.s32.totalorder %s4385_s8, %s4385_s8 }
  0xb5   : > { %p4388_p8 = pnand %p4386_p3, %p5539_p11  ;;  %p4395_p7 = por %p4394_p6, %p4393_p2 }
  0xb7   : > { %p4389_p9 = pneg %p4388_p8 }
  0xb9   : > { %p4396_p4 = pnand %p4395_p7, %p4389_p9 }
  0xbb   : > { %4399 = shalt.err (!%p4396_p4)
}
  0xbc   : > { %4003 = dma.hbm_to_vmem [thread:$0]  (!%p5540_p13), %s5472_s12, 768, %s562_s11, [#allocation14], %s5542_s24, %s5542_s24, %s5541_s3  }
  0xbd   : > { %s597_s22 = scalar_lea.vmem [#allocation8], %s4806_s10  ;;  %s4920_s1 = scalar_lea.hbm %s5475_s15, %s4809_s16 }
  0xbe   : > { %s604_s6 = sshll.u32 %s597_s22, 4  ;;  %s4400_s23 = scalar_lea.hbm %s4903_s21, 128  ;;  %s605_s6 = int_to_ptr.vmem [resolvable:$true] %s604_s6 }
  0xbf   : > { %p4401_p11 = scmp.ne.s32.totalorder %s4903_s21, %s4400_s23  ;;  %s4405_s20 = scalar_lea.hbm %s5464_s4, 256 }
  0xc0   : > { %p4406_p13 = scmp.lt.s32.totalorder %s4903_s21, %s5464_s4  ;;  %p4407_p5 = scmp.lt.s32.totalorder %s4405_s20, %s4400_s23 }
  0xc1   : > { %p4403_p10 = pnand %p4401_p11, %p4832_p0 }
  0xc2   : > { %p4408_p3 = por %p4407_p5, %p4406_p13 }
  0xc3   : > { %p4404_p1 = pneg %p4403_p10 }
  0xc5   : > { %p4409_p8 = pnand %p4408_p3, %p4404_p1 }
  0xc7   : > { %4412 = shalt.err (!%p4409_p8)
}
  0xc8   : > { %s4413_s3 = scalar_lea.vmem %s605_s6, 128  ;;  %s4589_s16 = smov [#allocation8]  }
  0xc9   : > { %p4414_p9 = scmp.ne.s32.totalorder %s605_s6, %s4413_s3  ;;  %s4418_s24 = sshll.u32 %s4589_s16, 4  ;;  %s4419_s24 = int_to_ptr.vmem [resolvable:$false] %s4418_s24 }
  0xca   : > { %s4420_s11 = scalar_lea.vmem %s4419_s24, 256  ;;  %p4421_p7 = scmp.lt.s32.totalorder %s605_s6, %s4419_s24 }
  0xcb   : > { %p4416_p2 = pnand %p4414_p9, %p4832_p0  ;;  %p4422_p4 = scmp.lt.s32.totalorder %s4420_s11, %s4413_s3 }
  0xcd   : > { %p4417_p6 = pneg %p4416_p2  ;;  %p4423_p11 = por %p4422_p4, %p4421_p7 }
  0xcf   : > { %p4424_p10 = pnand %p4423_p11, %p4417_p6 }
  0xd1   : > { %4427 = shalt.err (!%p4424_p10)
}
  0xd2   : > { %4010 = dma.hbm_to_vmem [thread:$0]  (!%p4820_p12), %s4903_s21, 128, %s605_s6, %s4826_s26  }
  0xd3   : > { %s640_s5 = scalar_lea.vmem [#allocation18], %s4806_s10  ;;  %s4428_s13 = scalar_lea.hbm %s4920_s1, 128 }
  0xd4   : > { %s647_s22 = sshll.u32 %s640_s5, 4  ;;  %p4429_p1 = scmp.ne.s32.totalorder %s4920_s1, %s4428_s13  ;;  %s648_s22 = int_to_ptr.vmem [resolvable:$true] %s647_s22 }
  0xd5   : > { %s4433_s29 = scalar_lea.hbm %s5475_s15, 256  ;;  %p4434_p3 = scmp.lt.s32.totalorder %s4920_s1, %s5475_s15 }
  0xd6   : > { %p4431_p13 = pnand %p4429_p1, %p4832_p0  ;;  %p4435_p8 = scmp.lt.s32.totalorder %s4433_s29, %s4428_s13 }
  0xd8   : > { %p4432_p5 = pneg %p4431_p13  ;;  %p4436_p9 = por %p4435_p8, %p4434_p3 }
  0xda   : > { %p4437_p2 = pnand %p4436_p9, %p4432_p5 }
  0xdc   : > { %4440 = shalt.err (!%p4437_p2)
}
  0xdd   : > { %s4441_s26 = scalar_lea.vmem %s648_s22, 128  ;;  %s4590_s10 = smov [#allocation18]  }
  0xde   : > { %p4442_p6 = scmp.ne.s32.totalorder %s648_s22, %s4441_s26  ;;  %s4446_s21 = sshll.u32 %s4590_s10, 4  ;;  %s4447_s21 = int_to_ptr.vmem [resolvable:$false] %s4446_s21 }
  0xdf   : > { %s4448_s6 = scalar_lea.vmem %s4447_s21, 256  ;;  %p4449_p11 = scmp.lt.s32.totalorder %s648_s22, %s4447_s21 }
  0xe0   : > { %p4444_p7 = pnand %p4442_p6, %p4832_p0  ;;  %p4450_p10 = scmp.lt.s32.totalorder %s4448_s6, %s4441_s26 }
  0xe2   : > { %p4445_p4 = pneg %p4444_p7  ;;  %p4451_p1 = por %p4450_p10, %p4449_p11 }
  0xe4   : > { %p4452_p13 = pnand %p4451_p1, %p4445_p4 }
  0xe6   : > { %4455 = shalt.err (!%p4452_p13)
}
  0xe7   : > { %4016 = dma.hbm_to_vmem [thread:$0]  (!%p4820_p12), %s4920_s1, 128, %s648_s22, %s4860_s7  }
  0xe8   : > { %p5544_p5 = scmp.ne.s32.totalorder %s5518_s30, 0 }
  0xe9   : > { %p5545_p0 = scmp.eq.s32.totalorder (!%p5544_p5), %s4711_s0, 0 }
  0xea   : > { %656 = sbr.rel (%p5544_p5) target bundleno = 4338 (0x10f2), region = 84 }
  0xef   : > { %4525 = dma.done.wait (%p5545_p0), [#allocation3], 256   ;;  %p5546_p3 = pmov %p5545_p0 }
  0xf0   : > { %p5547_p8 = pmov %p5545_p0 }
  0xf1   : > { %4527 = vsyncadd (%p5546_p3), [#allocation3], 4294967040 }
  0xf2   : > { %4529 = dma.done.wait (%p5547_p8), [#allocation6], 256   ;;  %p5548_p9 = pmov %p5545_p0 }
  0xf3   : > { %s666_s19 = sand.u32 1, %s4711_s0   ;;  %s4969_s2 = sand.u32 1, %s4566_s25  }
  0xf4   : > { %4531 = vsyncadd (%p5548_p9), [#allocation6], 4294967040  ;;  %s4972_s30 = sshll.u32 %s4969_s2, 3  ;;  %s667_s7 = scalar_lea.sflag [#allocation3], %s666_s19 }
  0xf5   : > { %s670_s1 = scalar_lea.vmem [#allocation7], %s4972_s30  ;;  %p5549_p12 = scmp.ne.s32.totalorder %s5529_s28, 0 }
  0xf7   : > { %4533 = dma.done.wait (%p5549_p12), %s667_s7, 256  }
  0xf8   : > { %4535 = vsyncadd (%p5549_p12), %s667_s7, 4294967040  ;;  %s679_s17 = scalar_lea.vmem [#allocation8], %s4972_s30  ;;  %p5550_p2 = pmov %p5545_p0 }
  0xf9   : > { %p5551_p6 = pmov %p5545_p0 }
  0xfa   : > { %4537 = dma.done.wait (%p5550_p2), [#allocation6], 512  }
  0xfb   : > { %4539 = vsyncadd (%p5551_p6), [#allocation6], 4294966784  ;;  %p5552_p7 = pmov %p5545_p0 }
  0xfc   : > { %p5553_p4 = pmov %p5545_p0 }
  0xfd   : > { %4541 = dma.done.wait (%p5552_p7), [#allocation11], 1024  }
  0xfe   : > { %4543 = vsyncadd (%p5553_p4), [#allocation11], 4294966272  ;;  %p5554_p11 = pmov %p5545_p0 }
  0xff   : > { %p5555_p10 = pmov %p5545_p0 }
 0x100   : > { %4545 = dma.done.wait (%p5554_p11), [#allocation14], 1536  }
 0x101   : > { %4547 = vsyncadd (%p5555_p10), [#allocation14], 4294965760  ;;  %s705_s3 = scalar_lea.sflag [#allocation17], %s666_s19  ;;  %s708_s16 = scalar_lea.vmem [#allocation16], %s4972_s30 }
 0x102   : > { %4549 = dma.done.wait (%p5549_p12), %s705_s3, 256  }
 0x103   : > { %4551 = vsyncadd (%p5549_p12), %s705_s3, 4294967040  ;;  %v4591_v0 = vmov 0.0   ;;  %vm4592_vm0 = vmmov 0   ;;  %v4092_v1 = vld [vmem:[#allocation9 + $0x8] sm:$0xff]   ;;  %v4093_v2 = vld [vmem:[#allocation9] sm:$0xff]   ;;  %vm824_vm1 = vcmask 261120  }
 0x104   : > { %3670 = vmatprep.subr.bf16.mxu0 %v4591_v0  ;;  %3674 = vmatprep.mubr.msk.bf16.mxu0 %vm4592_vm0, %v4591_v0  ;;  %v797_v3 = vld [vmem:[#allocation2] sm:$0xff]  ;;  %v798_v4 = vld [vmem:[#allocation2 + $0x8] sm:$0xff]  ;;  %v4094_v6 = vld [vmem:[#allocation9 + $0x18] sm:$0xff]   ;;  %s5556_s11 = sld [smem:[#allocation42_spill]]  ;;  %s4593_s13 = smov 96   ;;  %vm1208_vm2 = vcmask 64512  }
 0x105   : > { %3678 = vmatprep.subr.bf16.mxu1 %v4591_v0  ;;  %3682 = vmatprep.mubr.msk.bf16.mxu1 %vm4592_vm0, %v4591_v0  ;;  %v800_v5 = vpack.c.bf16 %v798_v4, %v797_v3  ;;  %v4095_v7 = vld [vmem:[#allocation9 + $0x10] sm:$0xff]   ;;  %v939_v9 = vld [vmem:[#allocation5 + $0x8] sm:$0xff]  ;;  %v4096_v11 = vld [vmem:[#allocation13 + $0x8] sm:$0xff]   ;;  %s5557_s29 = sld [smem:[#allocation44_spill]]  ;;  %s4594_s8 = smov 120   ;;  %vm1255_vm3 = vcmask 130048  }
 0x106   : > { %3671 = vmatpush3.bf16.msra.mxu0 %v4092_v1  ;;  %v938_v8 = vld [vmem:[#allocation5] sm:$0xff]  ;;  %v4097_v12 = vld [vmem:[#allocation10 + $0x8] sm:$0xff]   ;;  %v4098_v13 = vld [vmem:[#allocation13] sm:$0xff]   ;;  %s4595_s20 = smov 112   ;;  %s4596_s26 = smov 104   ;;  %vm2730_vm4 = vcmask 1043456  }
 0x107   : > { %3672 = vmatprep.subr.bf16.mxu0 %v4591_v0  ;;  %v941_v10 = vpack.c.bf16 %v939_v9, %v938_v8  ;;  %3679 = vmatpush3.bf16.msra.mxu1 %v4097_v12  ;;  %v4099_v14 = vld [vmem:[#allocation10] sm:$0xff]   ;;  %v4100_v17 = vld [vmem:[#allocation10 + $0x18] sm:$0xff]   ;;  %v4101_v18 = vld [vmem:[#allocation10 + $0x10] sm:$0xff]   ;;  %p792_p1 = scmp.lt.s32.totalorder %s4711_s0, 1  ;;  %s5558_s7 = sld [smem:[#allocation47_spill]] }
 0x108   : > { %3680 = vmatprep.subr.bf16.mxu1 %v4591_v0  ;;  %v799_v15 = vld [vmem:[%s670_s1] sm:$0xff]  ;;  %v940_v19 = vld [vmem:[%s679_s17] sm:$0xff]  ;;  %s717_s24 = scalar_lea.vmem [#allocation18], %s4972_s30  ;;  %s784_s6 = scalar_lea.vmem [#allocation19], %s4972_s30 }
 0x109   : > { %v869_v16 = vpack.c.bf16 %v799_v15, %v799_v15  ;;  %v1011_v20 = vpack.c.bf16 %v940_v19, %v940_v19  ;;  %v4102_v21 = vld [vmem:[#allocation15 + $0x8] sm:$0xff]   ;;  %v4103_v22 = vld [vmem:[#allocation15] sm:$0xff]   ;;  %v4106_v9 = vld [vmem:[#allocation15 + $0x18] sm:$0xff]   ;;  %s793_s10 = scalar_select %p792_p1, %s4711_s0, 1 }
 0x10a   : > { %3673 = vmatpush3.bf16.msra.mxu0 %v4093_v2  ;;  %v3498_v24 = vld [vmem:[%s5556_s11] ss:$0 sm:$0xff]  ;;  %v3507_v32 = vld [vmem:[%s5556_s11 + $0x1] ss:$0 sm:$0xff]  ;;  %s3572_s19 = sshll.u32 %s4711_s0, 7  ;;  %s3209_s28 = sshll.u32 %s784_s6, 4  ;;  %s3210_s28 = int_to_ptr.vmem [resolvable:$true] %s3209_s28 }
 0x10b   : > { %3686 = vmatprep.subr.bf16.mxu0 %v4591_v0  ;;  %3681 = vmatpush3.bf16.msra.mxu1 %v4099_v14  ;;  %v3502_v49 = vld [vmem:[%s5557_s29] ss:$0 sm:$0xff]  ;;  %s3497_s21 = sshll.u32 %s793_s10, 3  ;;  %s4456_s5 = scalar_lea.vmem %s3210_s28, 128 }
 0x10c   : > { %3694 = vmatprep.subr.bf16.mxu1 %v4591_v0  ;;  %v4105_v8 = vld [vmem:[#allocation13 + $0x10] sm:$0xff]   ;;  %p4457_p13 = scmp.ne.s32.totalorder %s3210_s28, %s4456_s5  ;;  %s4598_s22 = smov [#allocation19]  }
 0x10d   : > { %3675 = vmatmul.mubr.msk.bf16.vlgmr.msra.gmra.mxu0 %vm824_vm1, %v800_v5  ;;  %v4104_v5 = vld [vmem:[#allocation13 + $0x18] sm:$0xff]   ;;  %s795_s3 = scalar_lea.vmem %s5558_s7, %s3497_s21  ;;  %s5562_s21 = sld [smem:[#allocation35_spill]] }
 0x10e   : > { %3687 = vmatpush3.bf16.msra.mxu0 %v4094_v6  ;;  %3690 = vmatprep.mubr.msk.bf16.mxu0 %vm4592_vm0, %v4591_v0  ;;  %s4460_s18 = sshll.u32 %s4598_s22, 4  ;;  %s4461_s18 = int_to_ptr.vmem [resolvable:$false] %s4460_s18 }
 0x10f   : > { %3688 = vmatprep.subr.bf16.mxu0 %v4591_v0  ;;  %3683 = vmatmul.mubr.msk.bf16.vlgmr.msra.gmra.mxu1 %vm824_vm1, %v869_v16  ;;  %s4462_s23 = scalar_lea.vmem %s4461_s18, 256  ;;  %p4463_p8 = scmp.lt.s32.totalorder %s3210_s28, %s4461_s18 }
 0x110   : > { %3695 = vmatpush3.bf16.msra.mxu1 %v4100_v17  ;;  %3698 = vmatprep.mubr.msk.bf16.mxu1 %vm4592_vm0, %v4591_v0  ;;  %p4464_p9 = scmp.lt.s32.totalorder %s4462_s23, %s4456_s5 }
 0x111   : > { %3696 = vmatprep.subr.bf16.mxu1 %v4591_v0 }
 0x112   : > { %3689 = vmatpush3.bf16.msra.mxu0 %v4095_v7  ;;  %p4465_p12 = por %p4464_p9, %p4463_p8 }
 0x113   : > { %3702 = vmatprep.subr.bf16.mxu0 %v4591_v0  ;;  %p5564_p5 = scmp.ne.s32.totalorder %s5562_s21, 0 }
 0x114   : > { %3697 = vmatpush3.bf16.msra.mxu1 %v4101_v18 }
 0x115   : > { %3691 = vmatmul.mubr.msk.bf16.vlgmr.msra.gmra.mxu0 %vm824_vm1, %v941_v10  ;;  %3710 = vmatprep.subr.bf16.mxu1 %v4591_v0  ;;  %p4458_p0 = pnand %p4457_p13, %p5564_p5 }
 0x116   : > { %3706 = vmatprep.mubr.msk.bf16.mxu0 %vm4592_vm0, %v4591_v0  ;;  %3703 = vmatpush3.bf16.msra.mxu0 %v4096_v11  ;;  %v4107_v11 = vld [vmem:[#allocation15 + $0x10] sm:$0xff]  }
 0x117   : > { %3704 = vmatprep.subr.bf16.mxu0 %v4591_v0  ;;  %3699 = vmatmul.mubr.msk.bf16.vlgmr.msra.gmra.mxu1 %vm824_vm1, %v1011_v20  ;;  %p4459_p3 = pneg %p4458_p0 }
 0x118   : > { %3711 = vmatpush3.bf16.msra.mxu1 %v4102_v21  ;;  %3714 = vmatprep.mubr.msk.bf16.mxu1 %vm4592_vm0, %v4591_v0 }
 0x119   : > { %3712 = vmatprep.subr.bf16.mxu1 %v4591_v0  ;;  %p4466_p2 = pnand %p4465_p12, %p4459_p3 }
 0x11a   : > { %3705 = vmatpush3.bf16.msra.mxu0 %v4098_v13 }
 0x11b   : > { %3718 = vmatprep.subr.bf16.mxu0 %v4591_v0 }
 0x11c   : > { %3713 = vmatpush3.bf16.msra.mxu1 %v4103_v22 }
 0x11d   : > { %3724 = vmatprep.subr.bf16.mxu1 %v4591_v0 }
 0x1cd   : > { %v862_v23 = vpop.f32.mrf.mxu0 }
 0x1ce   : > { %v863_v27 = vadd.f32 %v3498_v24, %v862_v23 }
 0x1cf   : > { %v3676_v25 = vpop.f32.mrf.mxu0  ;;  %v930_v39 = vpop.f32.mrf.mxu1 }
 0x1d0   : > { %v931_v51 = vadd.f32 %v3502_v49, %v930_v39  ;;  %v5144_v49 = vld [vmem:[%s795_s3] sm:$0xff] }
 0x1d1   : > { %v865_v26 = vpop.f32.mrf.mxu0  ;;  %v3684_v40 = vpop.f32.mrf.mxu1 }
 0x1d2   : > { %v866_v28 = vadd.f32 %v3498_v24, %v865_v26  ;;  %v5051_v55 = vpack.c.bf16 %v931_v51, %v931_v51 }
 0x1d3   : > { %v3677_v29 = vpop.f32.mrf.mxu0  ;;  %v933_v41 = vpop.f32.mrf.mxu1 }
 0x1d4   : > { %v5034_v30 = vpack.c.bf16 %v866_v28, %v863_v27  ;;  %v5131_v41 = vld [vmem:[%s708_s16] sm:$0xff] }
 0x1d5   : > { %v1004_v31 = vpop.f32.mrf.mxu0  ;;  %v3685_v42 = vpop.f32.mrf.mxu1 }
 0x1d6   : > { %v1005_v35 = vadd.f32 %v3507_v32, %v1004_v31 }
 0x1d7   : > { %v3692_v33 = vpop.f32.mrf.mxu0  ;;  %v5043_v43 = vpop.f32.mrf.mxu1 }
 0x1d9   : > { %v1007_v34 = vpop.f32.mrf.mxu0  ;;  %v3700_v44 = vpop.f32.mrf.mxu1 }
 0x1da   : > { %v1008_v36 = vadd.f32 %v3507_v32, %v1007_v34 }
 0x1db   : > { %v3693_v37 = vpop.f32.mrf.mxu0  ;;  %v1077_v45 = vpop.f32.mrf.mxu1 }
 0x1dc   : > { %v1080_v38 = vpack.c.bf16 %v1008_v36, %v1005_v35 }
 0x1dd   : > { %v3701_v46 = vpop.f32.mrf.mxu1 }
 0x1de   : > { %1148 = vrot.lane.b32.xlu1 %v1080_v38, %s4593_s13  ;;  %3707 = vmatmul.mubr.msk.bf16.vlgmr.msra.gmra.mxu0 %vm824_vm1, %v1080_v38 }
 0x1df   : > { %3720 = vmatprep.mubr.msk.bf16.mxu0 %vm4592_vm0, %v4591_v0 }
 0x250   : > { %v1149_v47 = vpop.permute.xlu1 %1148 }
 0x251   : > { %3715 = vmatmul.mubr.msk.bf16.vlgmr.msra.gmra.mxu1 %vm824_vm1, %v1149_v47 }
 0x252   : > { %3726 = vmatprep.mubr.msk.bf16.mxu1 %vm4592_vm0, %v4591_v0 }
 0x29e   : > { %v1135_v48 = vpop.f32.mrf.mxu0 }
 0x2a0   : > { %v3708_v50 = vpop.f32.mrf.mxu0 }
 0x2a2   : > { %v1138_v52 = vpop.f32.mrf.mxu0 }
 0x2a3   : > { %v1142_v53 = vpack.c.bf16 %v1138_v52, %v1135_v48 }
 0x2a4   : > { %v3709_v54 = vpop.f32.mrf.mxu0 }
 0x2a5   : > { %1272 = vrot.lane.b32.xlu1 %v1142_v53, %s4594_s8  ;;  %1334 = vrot.lane.b32.xlu0 %v1142_v53, %s4595_s20  ;;  %v1213_v56 = vsel %vm1208_vm2, %v1142_v53, 0 }
 0x2a6   : > { %3719 = vmatpush3.bf16.xpose.msra.mxu0 %v1213_v56 }
 0x2a7   : > { %3730 = vmatprep.subr.bf16.mxu0 %v4591_v0 }
 0x2a9   : > { %1396 = vrot.lane.b32.xlu1 %v1142_v53, %s4596_s26  ;;  %1332 = vrot.lane.b32.xlu0 %v5051_v55, %s4595_s20 }
 0x2ad   : > { %1524 = vrot.lane.b32.xlu1 %v5034_v30, %s4593_s13  ;;  %1269 = vrot.lane.b32.xlu0 %v5051_v55, %s4594_s8  ;;  %s5559_s13 = sld [smem:[#allocation37_spill]] }
 0x2ae   : > { %3721 = vmatmul.mubr.msk.bf16.vlgmr.msra.gmra.mxu0 %vm1208_vm2, %v5051_v55 }
 0x2af   : > { %3732 = vmatprep.mubr.msk.bf16.mxu0 %vm4592_vm0, %v4591_v0 }
 0x2b1   : > { %1394 = vrot.lane.b32.xlu0 %v5051_v55, %s4596_s26 }
 0x311   : > { %v1199_v57 = vpop.f32.mrf.mxu1 }
 0x313   : > { %v3716_v58 = vpop.f32.mrf.mxu1 }
 0x315   : > { %v1202_v59 = vpop.f32.mrf.mxu1 }
 0x316   : > { %v5070_v60 = vpack.c.bf16 %v1202_v59, %v1199_v57 }
 0x317   : > { %v3717_v61 = vpop.f32.mrf.mxu1  ;;  %v1273_v62 = vpop.permute.xlu1 %1272 }
 0x318   : > { %v1278_v63 = vsel %vm1208_vm2, %v1273_v62, 0  ;;  %v1335_v1 = vpop.permute.xlu0 %1334 }
 0x319   : > { %v1340_v2 = vsel %vm1208_vm2, %v1335_v1, 0  ;;  %3725 = vmatpush3.bf16.xpose.msra.mxu1 %v1278_v63 }
 0x31a   : > { %3731 = vmatpush3.bf16.xpose.msra.mxu0 %v1340_v2  ;;  %3736 = vmatprep.subr.bf16.mxu1 %v4591_v0 }
 0x31b   : > { %3742 = vmatprep.subr.bf16.mxu0 %v4591_v0  ;;  %v1397_v4 = vpop.permute.xlu1 %1396 }
 0x31c   : > { %v5076_v3 = vpop.permute.xlu0 %1332  ;;  %v1402_v7 = vsel %vm1208_vm2, %v1397_v4, 0 }
 0x31f   : > { %v5104_v12 = vpop.permute.xlu1 %1524 }
 0x320   : > { %v5078_v6 = vpop.permute.xlu0 %1269 }
 0x321   : > { %3727 = vmatmul.mubr.msk.bf16.vlgmr.msra.gmra.mxu1 %vm1208_vm2, %v5078_v6  ;;  %3733 = vmatmul.mubr.msk.bf16.vlgmr.msra.gmra.mxu0 %vm1208_vm2, %v5076_v3 }
 0x322   : > { %3737 = vmatpush3.bf16.xpose.msra.mxu1 %v1402_v7  ;;  %3743 = vmatpush3.bf16.msra.mxu0 %v4104_v5 }
 0x323   : > { %3744 = vmatprep.subr.bf16.mxu0 %v4591_v0  ;;  %3738 = vmatprep.mubr.msk.bf16.mxu1 %vm4592_vm0, %v4591_v0 }
 0x324   : > { %3746 = vmatprep.mubr.msk.bf16.mxu0 %vm4592_vm0, %v4591_v0  ;;  %3750 = vmatprep.subr.bf16.mxu1 %v4591_v0  ;;  %v5092_v10 = vpop.permute.xlu0 %1394 }
 0x326   : > { %3745 = vmatpush3.bf16.msra.mxu0 %v4105_v8 }
 0x327   : > { %3758 = vmatprep.subr.bf16.mxu0 %v4591_v0 }
 0x329   : > { %3739 = vmatmul.mubr.msk.bf16.vlgmr.msra.gmra.mxu1 %vm1208_vm2, %v5092_v10  ;;  %3747 = vmatmul.mubr.msk.bf16.vlgmr.msra.gmra.mxu0 %vm824_vm1, %v5034_v30 }
 0x32a   : > { %3751 = vmatpush3.bf16.msra.mxu1 %v4106_v9  ;;  %3754 = vmatprep.mubr.msk.bf16.mxu1 %vm4592_vm0, %v4591_v0 }
 0x32b   : > { %3752 = vmatprep.subr.bf16.mxu1 %v4591_v0  ;;  %3760 = vmatprep.mubr.msk.bf16.mxu0 %vm4592_vm0, %v4591_v0 }
 0x32e   : > { %3753 = vmatpush3.bf16.msra.mxu1 %v4107_v11 }
 0x32f   : > { %3764 = vmatprep.subr.bf16.mxu1 %v4591_v0 }
 0x331   : > { %3755 = vmatmul.mubr.msk.bf16.vlgmr.msra.gmra.mxu1 %vm824_vm1, %v5104_v12 }
 0x332   : > { %3766 = vmatprep.mubr.msk.bf16.mxu1 %vm4592_vm0, %v4591_v0 }
 0x36e   : > { %v1249_v13 = vpop.f32.mrf.mxu0 }
 0x36f   : > { %v1250_v56 = vadd.f32 %v1249_v13, %v5144_v49 }
 0x370   : > { %v3722_v14 = vpop.f32.mrf.mxu0 }
 0x371   : > { %v1256_v58 = vsel %vm1255_vm3, %v1250_v56, -inf }
 0x372   : > { %v1252_v15 = vpop.f32.mrf.mxu0 }
 0x374   : > { %v3723_v16 = vpop.f32.mrf.mxu0 }
 0x3e1   : > { %v1314_v17 = vpop.f32.mrf.mxu1  ;;  %v5110_v18 = vpop.f32.mrf.mxu0 }
 0x3e2   : > { %v1315_v50 = vadd.f32 %v1314_v17, %v5144_v49 }
 0x3e3   : > { %v3728_v19 = vpop.f32.mrf.mxu1  ;;  %v3734_v20 = vpop.f32.mrf.mxu0 }
 0x3e4   : > { %v1320_v51 = vsel %vm1255_vm3, %v1315_v50, -inf }
 0x3e5   : > { %v1317_v21 = vpop.f32.mrf.mxu1  ;;  %v1379_v22 = vpop.f32.mrf.mxu0 }
 0x3e7   : > { %v3729_v23 = vpop.f32.mrf.mxu1  ;;  %v3735_v24 = vpop.f32.mrf.mxu0 }
 0x3e9   : > { %v5112_v25 = vpop.f32.mrf.mxu1  ;;  %v1510_v26 = vpop.f32.mrf.mxu0 }
 0x3eb   : > { %v3740_v27 = vpop.f32.mrf.mxu1  ;;  %v3748_v28 = vpop.f32.mrf.mxu0 }
 0x3ed   : > { %v1441_v29 = vpop.f32.mrf.mxu1  ;;  %v1513_v31 = vpop.f32.mrf.mxu0 }
 0x3ee   : > { %v5114_v32 = vpack.c.bf16 %v1513_v31, %v1510_v26 }
 0x3ef   : > { %v3741_v33 = vpop.f32.mrf.mxu1  ;;  %v3749_v34 = vpop.f32.mrf.mxu0 }
 0x3f0   : > { %v1585_v35 = vsel %vm1208_vm2, %v5114_v32, 0 }
 0x3f1   : > { %v1575_v36 = vpop.f32.mrf.mxu1  ;;  %3759 = vmatpush3.bf16.xpose.msra.mxu0 %v1585_v35 }
 0x3f2   : > { %3770 = vmatprep.subr.bf16.mxu0 %v4591_v0 }
 0x3f3   : > { %v3756_v37 = vpop.f32.mrf.mxu1 }
 0x3f5   : > { %v1578_v38 = vpop.f32.mrf.mxu1 }
 0x3f6   : > { %v5119_v39 = vpack.c.bf16 %v1578_v38, %v1575_v36 }
 0x3f7   : > { %v3757_v40 = vpop.f32.mrf.mxu1 }
 0x3f8   : > { %3761 = vmatmul.mubr.msk.bf16.vlgmr.msra.gmra.mxu0 %vm1208_vm2, %v5051_v55  ;;  %3765 = vmatpush3.bf16.msra.mxu1 %v5119_v39 }
 0x3f9   : > { %3771 = vmatpush3.bf16.msra.mxu0 %v5070_v60  ;;  %3776 = vmatprep.subr.bf16.mxu1 %v4591_v0 }
 0x3fa   : > { %3772 = vmatprep.mubr.msk.bf16.mxu0 %vm4592_vm0, %v4591_v0  ;;  %3782 = vmatprep.subr.bf16.mxu0 %v4591_v0 }
 0x4b8   : > { %v1621_v42 = vpop.f32.mrf.mxu0 }
 0x4b9   : > { %v1622_v44 = vadd.f32 %v1621_v42, %v5131_v41 }
 0x4ba   : > { %v3762_v45 = vpop.f32.mrf.mxu0 }
 0x4bb   : > { %v1627_v46 = vsel %vm1255_vm3, %v1622_v44, -inf }
 0x4bc   : > { %1628 = vmax.xlane.f32.xlu0 %v1627_v46  ;;  %v1624_v47 = vpop.f32.mrf.mxu0 }
 0x4be   : > { %v3763_v48 = vpop.f32.mrf.mxu0 }
 0x4d2   : > { %1726 = vrot.lane.b32.xlu0 %v5114_v32, %s4594_s8 }
 0x4d6   : > { %1877 = vrot.lane.b32.xlu0 %v5114_v32, %s4595_s20 }
 0x4f5   : > { %1321 = vmax.xlane.f32.xlu0 %v1320_v51 }
 0x545   : > { %v1629_v52 = vpop.xlane.xlu0 %1628 }
 0x546   : > { %v1630_v53 = vsub.f32 %v1622_v44, %v1629_v52 }
 0x548   : > { %v1631_v54 = vmul.f32 1.442695, %v1630_v53 }
 0x549   : > { %v1727_v59 = vpop.permute.xlu0 %1726 }
 0x54a   : > { %4112 = vpow2.f32 %v1631_v54  ;;  %v1729_v11 = vsel %vm1208_vm2, %v1727_v59, 0 }
 0x54d   : > { %v5151_v61 = vpop.permute.xlu0 %1877 }
 0x557   : > { %v4113_v55 = vpop.eup %4112 }
 0x558   : > { %v1633_v57 = vsel %vm1255_vm3, %v4113_v55, 0.0 }
 0x559   : > { %1634 = vadd.xlane.f32.xlu1 %v1633_v57 }
 0x55d   : > { %1257 = vmax.xlane.f32.xlu1 %v1256_v58  ;;  %v1880_v58 = vsel %vm1208_vm2, %v5151_v61, 0 }
 0x57e   : > { %v1322_v62 = vpop.xlane.xlu0 %1321 }
 0x57f   : > { %v1323_v63 = vsub.f32 %v1315_v50, %v1322_v62 }
 0x581   : > { %v1324_v1 = vmul.f32 1.442695, %v1323_v63 }
 0x583   : > { %4114 = vpow2.f32 %v1324_v1 }
 0x590   : > { %v4115_v2 = vpop.eup %4114 }
 0x591   : > { %v1326_v4 = vsel %vm1255_vm3, %v4115_v2, 0.0 }
 0x592   : > { %1327 = vadd.xlane.f32.xlu0 %v1326_v4 }
 0x5a8   : > { %1831 = vrot.lane.b32.xlu0 %v5070_v60, %s4594_s8 }
 0x5e2   : > { %v1635_v5 = vpop.xlane.xlu1 %1634 }
 0x5e3   : > { %4116 = vrcp.f32 %v1635_v5 }
 0x5e6   : > { %v1258_v19 = vpop.xlane.xlu1 %1257 }
 0x5e7   : > { %v1259_v20 = vsub.f32 %v1250_v56, %v1258_v19 }
 0x5f0   : > { %v4117_v7 = vpop.eup %4116 }
 0x5f1   : > { %v1637_v8 = vmul.f32 %v4117_v7, %v4113_v55 }
 0x5f3   : > { %v1638_v9 = vpack.c.bf16 %v1637_v8, %v1637_v8 }
 0x5f5   : > { %3767 = vmatmul.mubr.msk.bf16.vlgmr.msra.gmra.mxu1 %vm1255_vm3, %v1638_v9 }
 0x5f6   : > { %3777 = vmatpush3.bf16.xpose.msra.mxu1 %v1729_v11  ;;  %3778 = vmatprep.mubr.msk.bf16.mxu1 %vm4592_vm0, %v4591_v0 }
 0x5f7   : > { %3788 = vmatprep.subr.bf16.mxu1 %v4591_v0 }
 0x5fd   : > { %3779 = vmatmul.mubr.msk.bf16.vlgmr.msra.gmra.mxu1 %vm1208_vm2, %v5078_v6  ;;  %v1260_v6 = vmul.f32 1.442695, %v1259_v20 }
 0x5fe   : > { %3790 = vmatprep.mubr.msk.bf16.mxu1 %vm4592_vm0, %v4591_v0 }
 0x61b   : > { %v1328_v13 = vpop.xlane.xlu0 %1327 }
 0x61c   : > { %4118 = vrcp.f32 %v1328_v13 }
 0x61d   : > { %4120 = vpow2.f32 %v1260_v6  ;;  %v1377_v6 = vadd.f32 %v5110_v18, %v5144_v49 }
 0x61f   : > { %v1832_v14 = vpop.permute.xlu0 %1831 }
 0x620   : > { %3789 = vmatpush3.bf16.msra.mxu1 %v1832_v14 }
 0x621   : > { %3800 = vmatprep.subr.bf16.mxu1 %v4591_v0 }
 0x629   : > { %v4119_v15 = vpop.eup %4118 }
 0x62a   : > { %v1330_v16 = vmul.f32 %v4119_v15, %v4115_v2  ;;  %v4121_v31 = vpop.eup %4120 }
 0x62b   : > { %v1262_v35 = vsel %vm1255_vm3, %v4121_v31, 0.0 }
 0x62c   : > { %v1331_v17 = vpack.c.bf16 %v1330_v16, %v1330_v16 }
 0x62e   : > { %3791 = vmatmul.mubr.msk.bf16.vlgmr.msra.gmra.mxu1 %vm1255_vm3, %v1331_v17 }
 0x62f   : > { %3802 = vmatprep.mubr.msk.bf16.mxu1 %vm4592_vm0, %v4591_v0 }
 0x6b5   : > { %v5169_v21 = vpop.f32.mrf.mxu1 }
 0x6b7   : > { %v3768_v22 = vpop.f32.mrf.mxu1 }
 0x6b8   : > { %v1382_v22 = vsel %vm1255_vm3, %v1377_v6, -inf }
 0x6b9   : > { %v1679_v23 = vpop.f32.mrf.mxu1 }
 0x6bb   : > { %v3769_v24 = vpop.f32.mrf.mxu1 }
 0x6bd   : > { %v1765_v26 = vpop.f32.mrf.mxu1 }
 0x6be   : > { %v1766_v27 = vadd.f32 %v1765_v26, %v5131_v41 }
 0x6bf   : > { %v3780_v28 = vpop.f32.mrf.mxu1 }
 0x6c0   : > { %v1771_v29 = vsel %vm1255_vm3, %v1766_v27, -inf }
 0x6c1   : > { %1772 = vmax.xlane.f32.xlu1 %v1771_v29  ;;  %v1768_v33 = vpop.f32.mrf.mxu1 }
 0x6c3   : > { %v3781_v34 = vpop.f32.mrf.mxu1 }
 0x6c5   : > { %1263 = vadd.xlane.f32.xlu1 %v1262_v35 }
 0x6ee   : > { %v5174_v36 = vpop.f32.mrf.mxu1 }
 0x6f0   : > { %v3792_v37 = vpop.f32.mrf.mxu1 }
 0x6f2   : > { %v1874_v38 = vpop.f32.mrf.mxu1 }
 0x6f4   : > { %v3793_v40 = vpop.f32.mrf.mxu1 }
 0x74a   : > { %v1773_v42 = vpop.xlane.xlu1 %1772 }
 0x74b   : > { %v1774_v44 = vsub.f32 %v1766_v27, %v1773_v42 }
 0x74d   : > { %v1775_v45 = vmul.f32 1.442695, %v1774_v44 }
 0x74e   : > { %v1264_v46 = vpop.xlane.xlu1 %1263 }
 0x74f   : > { %4122 = vpow2.f32 %v1775_v45 }
 0x750   : > { %4124 = vrcp.f32 %v1264_v46 }
 0x75c   : > { %v4123_v47 = vpop.eup %4122 }
 0x75d   : > { %v4125_v48 = vpop.eup %4124  ;;  %v1777_v50 = vsel %vm1255_vm3, %v4123_v47, 0.0 }
 0x75e   : > { %1778 = vadd.xlane.f32.xlu1 %v1777_v50  ;;  %v1266_v51 = vmul.f32 %v4125_v48, %v4121_v31  ;;  %v5226_v48 = vadd.f32 %v5112_v25, %v5144_v49 }
 0x760   : > { %v1267_v52 = vpack.c.bf16 %v1266_v51, %v1266_v51  ;;  %v1444_v50 = vsel %vm1255_vm3, %v5226_v48, -inf }
 0x762   : > { %3773 = vmatmul.mubr.msk.bf16.vlgmr.msra.gmra.mxu0 %vm1255_vm3, %v1267_v52 }
 0x763   : > { %3784 = vmatprep.mubr.msk.bf16.mxu0 %vm4592_vm0, %v4591_v0 }
 0x76f   : > { %1784 = vrot.lane.b32.xlu1 %v5119_v39, %s4594_s8 }
 0x7e7   : > { %v1779_v53 = vpop.xlane.xlu1 %1778 }
 0x7e8   : > { %4126 = vrcp.f32 %v1779_v53 }
 0x7eb   : > { %v1785_v54 = vpop.permute.xlu1 %1784 }
 0x7ec   : > { %3783 = vmatpush3.bf16.msra.mxu0 %v1785_v54 }
 0x7ed   : > { %3794 = vmatprep.subr.bf16.mxu0 %v4591_v0 }
 0x7f5   : > { %v4127_v55 = vpop.eup %4126 }
 0x7f6   : > { %v1781_v56 = vmul.f32 %v4127_v55, %v4123_v47 }
 0x7f8   : > { %v1782_v57 = vpack.c.bf16 %v1781_v56, %v1781_v56 }
 0x7fa   : > { %3785 = vmatmul.mubr.msk.bf16.vlgmr.msra.gmra.mxu0 %vm1255_vm3, %v1782_v57 }
 0x7fb   : > { %3795 = vmatpush3.bf16.xpose.msra.mxu0 %v1880_v58  ;;  %3796 = vmatprep.mubr.msk.bf16.mxu0 %vm4592_vm0, %v4591_v0 }
 0x7fc   : > { %3806 = vmatprep.subr.bf16.mxu0 %v4591_v0 }
 0x802   : > { %3797 = vmatmul.mubr.msk.bf16.vlgmr.msra.gmra.mxu0 %vm1208_vm2, %v5076_v3 }
 0x803   : > { %3808 = vmatprep.mubr.msk.bf16.mxu0 %vm4592_vm0, %v4591_v0 }
 0x822   : > { %v5193_v59 = vpop.f32.mrf.mxu0 }
 0x824   : > { %v3774_v62 = vpop.f32.mrf.mxu0 }
 0x826   : > { %v1722_v63 = vpop.f32.mrf.mxu0 }
 0x828   : > { %v3775_v1 = vpop.f32.mrf.mxu0 }
 0x8ba   : > { %v5195_v61 = vpop.f32.mrf.mxu0 }
 0x8bc   : > { %v3786_v2 = vpop.f32.mrf.mxu0 }
 0x8be   : > { %v1827_v4 = vpop.f32.mrf.mxu0 }
 0x8bf   : > { %v4108_v4 = vld [vmem:[#allocation13 + $0x28] sm:$0xff]  }
 0x8c0   : > { %v3787_v5 = vpop.f32.mrf.mxu0 }
 0x8c2   : > { %v1916_v7 = vpop.f32.mrf.mxu0 }
 0x8c3   : > { %v1917_v8 = vadd.f32 %v1916_v7, %v5131_v41  ;;  %v4109_v7 = vld [vmem:[#allocation13 + $0x20] sm:$0xff]  }
 0x8c4   : > { %v3798_v9 = vpop.f32.mrf.mxu0 }
 0x8c5   : > { %v1922_v11 = vsel %vm1255_vm3, %v1917_v8, -inf }
 0x8c6   : > { %1923 = vmax.xlane.f32.xlu1 %v1922_v11  ;;  %v1919_v3 = vpop.f32.mrf.mxu0 }
 0x8c8   : > { %v3799_v13 = vpop.f32.mrf.mxu0 }
 0x8d7   : > { %1934 = vrot.lane.b32.xlu1 %v5119_v39, %s4595_s20 }
 0x94f   : > { %v1924_v14 = vpop.xlane.xlu1 %1923 }
 0x950   : > { %v1925_v15 = vsub.f32 %v1917_v8, %v1924_v14 }
 0x952   : > { %v1926_v16 = vmul.f32 1.442695, %v1925_v15 }
 0x953   : > { %v1935_v17 = vpop.permute.xlu1 %1934 }
 0x954   : > { %4128 = vpow2.f32 %v1926_v16  ;;  %3801 = vmatpush3.bf16.msra.mxu1 %v1935_v17  ;;  %v3512_v17 = vld [vmem:[%s5557_s29 + $0x1] ss:$0 sm:$0xff] }
 0x955   : > { %3812 = vmatprep.subr.bf16.mxu1 %v4591_v0 }
 0x961   : > { %v4129_v19 = vpop.eup %4128 }
 0x962   : > { %v1928_v20 = vsel %vm1255_vm3, %v4129_v19, 0.0 }
 0x963   : > { %1929 = vadd.xlane.f32.xlu0 %v1928_v20  ;;  %v1075_v20 = vadd.f32 %v3512_v17, %v5043_v43 }
 0x979   : > { %2026 = vrot.lane.b32.xlu0 %v5114_v32, %s4596_s26 }
 0x998   : > { %1383 = vmax.xlane.f32.xlu0 %v1382_v22 }
 0x9ec   : > { %v1930_v23 = vpop.xlane.xlu0 %1929 }
 0x9ed   : > { %4130 = vrcp.f32 %v1930_v23 }
 0x9f0   : > { %v2027_v27 = vpop.permute.xlu0 %2026 }
 0x9f1   : > { %v2029_v29 = vsel %vm1208_vm2, %v2027_v27, 0 }
 0x9fa   : > { %v4131_v24 = vpop.eup %4130 }
 0x9fb   : > { %v1932_v26 = vmul.f32 %v4131_v24, %v4129_v19  ;;  %v1081_v24 = vpack.c.bf16 %v1075_v20, %v1075_v20 }
 0x9fd   : > { %v1933_v28 = vpack.c.bf16 %v1932_v26, %v1932_v26 }
 0x9ff   : > { %3803 = vmatmul.mubr.msk.bf16.vlgmr.msra.gmra.mxu1 %vm1255_vm3, %v1933_v28 }
 0xa00   : > { %3813 = vmatpush3.bf16.xpose.msra.mxu1 %v2029_v29  ;;  %3814 = vmatprep.mubr.msk.bf16.mxu1 %vm4592_vm0, %v4591_v0 }
 0xa01   : > { %3824 = vmatprep.subr.bf16.mxu1 %v4591_v0 }
 0xa07   : > { %3815 = vmatmul.mubr.msk.bf16.vlgmr.msra.gmra.mxu1 %vm1208_vm2, %v5092_v10 }
 0xa08   : > { %3826 = vmatprep.mubr.msk.bf16.mxu1 %vm4592_vm0, %v4591_v0 }
 0xa21   : > { %v1384_v18 = vpop.xlane.xlu0 %1383 }
 0xa22   : > { %v1385_v32 = vsub.f32 %v1377_v6, %v1384_v18 }
 0xa24   : > { %v1386_v31 = vmul.f32 1.442695, %v1385_v32 }
 0xa26   : > { %4132 = vpow2.f32 %v1386_v31 }
 0xa33   : > { %v4133_v33 = vpop.eup %4132 }
 0xa34   : > { %v1388_v34 = vsel %vm1255_vm3, %v4133_v33, 0.0 }
 0xa35   : > { %1389 = vadd.xlane.f32.xlu0 %v1388_v34 }
 0xabf   : > { %v5218_v35 = vpop.f32.mrf.mxu1 }
 0xac1   : > { %v3804_v37 = vpop.f32.mrf.mxu1 }
 0xac3   : > { %v1977_v38 = vpop.f32.mrf.mxu1 }
 0xac5   : > { %v3805_v40 = vpop.f32.mrf.mxu1 }
 0xac6   : > { %v2726_v40 = vld [vmem:[#allocation12] sm:$0xf] }
 0xac7   : > { %v2065_v42 = vpop.f32.mrf.mxu1 }
 0xac8   : > { %v2066_v44 = vadd.f32 %v2065_v42, %v5131_v41  ;;  %v1390_v41 = vpop.xlane.xlu0 %1389  ;;  %v1720_v42 = vadd.f32 %v5193_v59, %v5169_v21 }
 0xac9   : > { %v3816_v10 = vpop.f32.mrf.mxu1  ;;  %4134 = vrcp.f32 %v1390_v41 }
 0xaca   : > { %v2071_v45 = vsel %vm1255_vm3, %v2066_v44, -inf }
 0xacb   : > { %2072 = vmax.xlane.f32.xlu1 %v2071_v45  ;;  %v2068_v46 = vpop.f32.mrf.mxu1  ;;  %v2724_v45 = vmul.f32 0.5, %v1720_v42 }
 0xacc   : > { %v2835_v46 = vld [vmem:[#allocation12 + $0x8] sm:$0xf] }
 0xacd   : > { %v3817_v47 = vpop.f32.mrf.mxu1  ;;  %v2840_v21 = vsel %vm2730_vm4, %v2835_v46, 0 }
 0xace   : > { %v2725_v47 = vpack.c.bf16 %v2724_v45, %v2724_v45 }
 0xad6   : > { %v4135_v51 = vpop.eup %4134 }
 0xad7   : > { %v1392_v54 = vmul.f32 %v4135_v51, %v4133_v33 }
 0xad9   : > { %v1393_v57 = vpack.c.bf16 %v1392_v54, %v1392_v54 }
 0xadc   : > { %1980 = vrot.lane.b32.xlu1 %v5070_v60, %s4595_s20 }
 0xb00   : > { %1445 = vmax.xlane.f32.xlu1 %v1444_v50 }
 0xb11   : > { %2129 = vrot.lane.b32.xlu1 %v5070_v60, %s4596_s26 }
 0xb54   : > { %v2073_v52 = vpop.xlane.xlu1 %2072 }
 0xb55   : > { %v2074_v53 = vsub.f32 %v2066_v44, %v2073_v52  ;;  %v2732_v44 = vsel %vm2730_vm4, %v2726_v40, 0 }
 0xb57   : > { %v2075_v55 = vmul.f32 1.442695, %v2074_v53 }
 0xb58   : > { %v1981_v56 = vpop.permute.xlu1 %1980 }
 0xb59   : > { %4136 = vpow2.f32 %v2075_v55  ;;  %3807 = vmatpush3.bf16.msra.mxu0 %v1981_v56 }
 0xb5a   : > { %3818 = vmatprep.subr.bf16.mxu0 %v4591_v0 }
 0xb5c   : > { %3809 = vmatmul.mubr.msk.bf16.vlgmr.msra.gmra.mxu0 %vm1255_vm3, %v1393_v57 }
 0xb5d   : > { %3820 = vmatprep.mubr.msk.bf16.mxu0 %vm4592_vm0, %v4591_v0 }
 0xb66   : > { %v4137_v25 = vpop.eup %4136 }
 0xb67   : > { %v2077_v60 = vsel %vm1255_vm3, %v4137_v25, 0.0 }
 0xb68   : > { %2078 = vadd.xlane.f32.xlu0 %v2077_v60 }
 0xb7e   : > { %2083 = vrot.lane.b32.xlu0 %v5119_v39, %s4596_s26 }
 0xb89   : > { %v1446_v49 = vpop.xlane.xlu1 %1445 }
 0xb8a   : > { %v1447_v43 = vsub.f32 %v5226_v48, %v1446_v49 }
 0xb8c   : > { %v1448_v26 = vmul.f32 1.442695, %v1447_v43 }
 0xb8d   : > { %v2130_v58 = vpop.permute.xlu1 %2129 }
 0xb8e   : > { %3825 = vmatpush3.bf16.msra.mxu1 %v2130_v58  ;;  %v4111_v58 = vld [vmem:[#allocation15 + $0x20] sm:$0xff]  }
 0xb8f   : > { %3838 = vmatprep.subr.bf16.mxu1 %v4591_v0 }
 0xbf1   : > { %v2079_v62 = vpop.xlane.xlu0 %2078 }
 0xbf2   : > { %4138 = vrcp.f32 %v2079_v62 }
 0xbf3   : > { %4140 = vpow2.f32 %v1448_v26 }
 0xbf5   : > { %v2084_v63 = vpop.permute.xlu0 %2083 }
 0xbf6   : > { %3819 = vmatpush3.bf16.msra.mxu0 %v2084_v63 }
 0xbf7   : > { %3830 = vmatprep.subr.bf16.mxu0 %v4591_v0 }
 0xbff   : > { %v4139_v1 = vpop.eup %4138 }
 0xc00   : > { %v2081_v2 = vmul.f32 %v4139_v1, %v4137_v25  ;;  %v4141_v27 = vpop.eup %4140  ;;  %v4110_v25 = vld [vmem:[#allocation15 + $0x28] sm:$0xff]  }
 0xc01   : > { %v1450_v28 = vsel %vm1255_vm3, %v4141_v27, 0.0 }
 0xc02   : > { %v2082_v5 = vpack.c.bf16 %v2081_v2, %v2081_v2 }
 0xc04   : > { %3821 = vmatmul.mubr.msk.bf16.vlgmr.msra.gmra.mxu0 %vm1255_vm3, %v2082_v5 }
 0xc05   : > { %3831 = vmatpush3.bf16.msra.mxu0 %v4108_v4  ;;  %3834 = vmatprep.mubr.msk.bf16.mxu0 %vm4592_vm0, %v4591_v0 }
 0xc06   : > { %3832 = vmatprep.subr.bf16.mxu0 %v4591_v0 }
 0xc09   : > { %3833 = vmatpush3.bf16.msra.mxu0 %v4109_v7 }
 0xc0a   : > { %3846 = vmatprep.subr.bf16.mxu0 %v4591_v0 }
 0xc0c   : > { %3835 = vmatmul.mubr.msk.bf16.vlgmr.msra.gmra.mxu0 %vm824_vm1, %v5034_v30 }
 0xc0d   : > { %3848 = vmatprep.mubr.msk.bf16.mxu0 %vm4592_vm0, %v4591_v0 }
 0xc1c   : > { %v5250_v39 = vpop.f32.mrf.mxu0 }
 0xc1d   : > { %v2021_v48 = vadd.f32 %v5250_v39, %v5218_v35  ;;  %v2293_v35 = vld [vmem:[%s717_s24] sm:$0xff]  ;;  %s3191_s24 = scalar_lea.sflag [#allocation4], %s4969_s2 }
 0xc1e   : > { %v3810_v8 = vpop.f32.mrf.mxu0 }
 0xc1f   : > { %v2832_v59 = vmul.f32 0.5, %v2021_v48 }
 0xc20   : > { %v2023_v9 = vpop.f32.mrf.mxu0 }
 0xc21   : > { %v2833_v50 = vpack.c.bf16 %v2832_v59, %v2832_v59 }
 0xc22   : > { %v3811_v11 = vpop.f32.mrf.mxu0 }
 0xcc4   : > { %v5252_v3 = vpop.f32.mrf.mxu0 }
 0xcc6   : > { %v3822_v13 = vpop.f32.mrf.mxu0 }
 0xcc8   : > { %v2126_v14 = vpop.f32.mrf.mxu0 }
 0xcca   : > { %v3823_v15 = vpop.f32.mrf.mxu0 }
 0xccc   : > { %v2226_v16 = vpop.f32.mrf.mxu0 }
 0xcce   : > { %v3836_v19 = vpop.f32.mrf.mxu0 }
 0xcd0   : > { %v2229_v30 = vpop.f32.mrf.mxu0 }
 0xcd1   : > { %v2233_v6 = vpack.c.bf16 %v2229_v30, %v2226_v16 }
 0xcd2   : > { %v3837_v22 = vpop.f32.mrf.mxu0 }
 0xcd3   : > { %2399 = vrot.lane.b32.xlu0 %v2233_v6, %s4594_s8  ;;  %v2298_v23 = vsel %vm1208_vm2, %v2233_v6, 0 }
 0xcd4   : > { %3847 = vmatpush3.bf16.xpose.msra.mxu0 %v2298_v23 }
 0xcd5   : > { %3858 = vmatprep.subr.bf16.mxu0 %v4591_v0 }
 0xcd7   : > { %2396 = vrot.lane.b32.xlu0 %v1081_v24, %s4594_s8 }
 0xcdb   : > { %2508 = vrot.lane.b32.xlu0 %v2233_v6, %s4595_s20  ;;  %3849 = vmatmul.mubr.msk.bf16.vlgmr.msra.gmra.mxu0 %vm1208_vm2, %v1081_v24 }
 0xcdc   : > { %3860 = vmatprep.mubr.msk.bf16.mxu0 %vm4592_vm0, %v4591_v0 }
 0xcdf   : > { %2506 = vrot.lane.b32.xlu0 %v1081_v24, %s4595_s20 }
 0xce3   : > { %2616 = vrot.lane.b32.xlu0 %v2233_v6, %s4596_s26 }
 0xce7   : > { %2614 = vrot.lane.b32.xlu0 %v1081_v24, %s4596_s26 }
 0xd06   : > { %1451 = vadd.xlane.f32.xlu0 %v1450_v28 }
 0xd45   : > { %v2400_v29 = vpop.permute.xlu0 %2399 }
 0xd46   : > { %v2405_v18 = vsel %vm1208_vm2, %v2400_v29, 0 }
 0xd47   : > { %3859 = vmatpush3.bf16.xpose.msra.mxu0 %v2405_v18 }
 0xd48   : > { %3870 = vmatprep.subr.bf16.mxu0 %v4591_v0 }
 0xd49   : > { %v2397_v32 = vpop.permute.xlu0 %2396 }
 0xd4d   : > { %v2509_v31 = vpop.permute.xlu0 %2508 }
 0xd4e   : > { %v2514_v33 = vsel %vm1208_vm2, %v2509_v31, 0  ;;  %3861 = vmatmul.mubr.msk.bf16.vlgmr.msra.gmra.mxu0 %vm1208_vm2, %v2397_v32 }
 0xd4f   : > { %3871 = vmatpush3.bf16.xpose.msra.mxu0 %v2514_v33  ;;  %3872 = vmatprep.mubr.msk.bf16.mxu0 %vm4592_vm0, %v4591_v0 }
 0xd50   : > { %3882 = vmatprep.subr.bf16.mxu0 %v4591_v0 }
 0xd51   : > { %v2507_v34 = vpop.permute.xlu0 %2506 }
 0xd55   : > { %v2617_v37 = vpop.permute.xlu0 %2616 }
 0xd56   : > { %v2622_v38 = vsel %vm1208_vm2, %v2617_v37, 0  ;;  %3873 = vmatmul.mubr.msk.bf16.vlgmr.msra.gmra.mxu0 %vm1208_vm2, %v2507_v34 }
 0xd57   : > { %3883 = vmatpush3.bf16.xpose.msra.mxu0 %v2622_v38  ;;  %3884 = vmatprep.mubr.msk.bf16.mxu0 %vm4592_vm0, %v4591_v0 }
 0xd58   : > { %3894 = vmatprep.subr.bf16.mxu0 %v4591_v0 }
 0xd59   : > { %v2615_v10 = vpop.permute.xlu0 %2614 }
 0xd5e   : > { %3885 = vmatmul.mubr.msk.bf16.vlgmr.msra.gmra.mxu0 %vm1208_vm2, %v2615_v10 }
 0xd5f   : > { %3895 = vmatpush3.bf16.msra.mxu0 %v2732_v44  ;;  %3896 = vmatprep.mubr.msk.bf16.mxu0 %vm4592_vm0, %v4591_v0 }
 0xd60   : > { %3906 = vmatprep.subr.bf16.mxu0 %v4591_v0 }
 0xd66   : > { %3897 = vmatmul.mubr.msk.bf16.vlgmr.msra.gmra.mxu0 %vm1208_vm2, %v2725_v47 }
 0xd67   : > { %3907 = vmatpush3.bf16.msra.mxu0 %v2840_v21  ;;  %3908 = vmatprep.mubr.msk.bf16.mxu0 %vm4592_vm0, %v4591_v0 }
 0xd68   : > { %3918 = vmatprep.subr.bf16.mxu0 %v4591_v0 }
 0xd6e   : > { %3909 = vmatmul.mubr.msk.bf16.vlgmr.msra.gmra.mxu0 %vm1208_vm2, %v2833_v50 }
 0xd6f   : > { %3920 = vmatprep.mubr.msk.bf16.mxu0 %vm4592_vm0, %v4591_v0 }
 0xd8f   : > { %v1452_v41 = vpop.xlane.xlu0 %1451 }
 0xd90   : > { %4142 = vrcp.f32 %v1452_v41 }
 0xd9b   : > { %v2334_v51 = vpop.f32.mrf.mxu0 }
 0xd9c   : > { %v2335_v52 = vadd.f32 %v2334_v51, %v2293_v35 }
 0xd9d   : > { %v4143_v53 = vpop.eup %4142  ;;  %v3850_v54 = vpop.f32.mrf.mxu0 }
 0xd9e   : > { %v2340_v55 = vsel %vm1255_vm3, %v2335_v52, -inf  ;;  %v1454_v56 = vmul.f32 %v4143_v53, %v4141_v27 }
 0xd9f   : > { %2341 = vmax.xlane.f32.xlu1 %v2340_v55  ;;  %v2337_v57 = vpop.f32.mrf.mxu0 }
 0xda0   : > { %v1455_v60 = vpack.c.bf16 %v1454_v56, %v1454_v56 }
 0xda1   : > { %v3851_v49 = vpop.f32.mrf.mxu0 }
 0xda2   : > { %3827 = vmatmul.mubr.msk.bf16.vlgmr.msra.gmra.mxu1 %vm1255_vm3, %v1455_v60 }
 0xda3   : > { %3839 = vmatpush3.bf16.msra.mxu1 %v4110_v25  ;;  %3842 = vmatprep.mubr.msk.bf16.mxu1 %vm4592_vm0, %v4591_v0 }
 0xda4   : > { %3840 = vmatprep.subr.bf16.mxu1 %v4591_v0 }
 0xda7   : > { %3841 = vmatpush3.bf16.msra.mxu1 %v4111_v58 }
 0xda8   : > { %3852 = vmatprep.subr.bf16.mxu1 %v4591_v0 }
 0xdaa   : > { %3843 = vmatmul.mubr.msk.bf16.vlgmr.msra.gmra.mxu1 %vm824_vm1, %v5104_v12 }
 0xdab   : > { %3854 = vmatprep.mubr.msk.bf16.mxu1 %vm4592_vm0, %v4591_v0 }
 0xe0e   : > { %v2441_v62 = vpop.f32.mrf.mxu0 }
 0xe0f   : > { %v2442_v63 = vadd.f32 %v2441_v62, %v2293_v35  ;;  %v2963_v62 = vld [vmem:[#allocation12 + $0x10] sm:$0xf] }
 0xe10   : > { %v3862_v1 = vpop.f32.mrf.mxu0 }
 0xe11   : > { %v2447_v2 = vsel %vm1255_vm3, %v2442_v63, -inf  ;;  %v2722_v1 = vld [vmem:[%s5559_s13] sm:$0x1] }
 0xe12   : > { %2448 = vmax.xlane.f32.xlu0 %v2447_v2  ;;  %v2444_v4 = vpop.f32.mrf.mxu0  ;;  %v2935_v2 = vlaneseq }
 0xe13   : > { %v4597_v4 = vmov 0  }
 0xe14   : > { %v3863_v5 = vpop.f32.mrf.mxu0  ;;  %4091 = vset.pattern.permute.xlu0 %v4597_v4  ;;  %4090 = vset.pattern.permute.xlu1 %v4597_v4 }
 0xe15   : > { %v2936_v5 = vshrl.u32 %v2935_v2, 7 }
 0xe16   : > { %v2550_v7 = vpop.f32.mrf.mxu0 }
 0xe17   : > { %v2551_v39 = vadd.f32 %v2550_v7, %v2293_v35  ;;  %v2944_v7 = vsub.f32 1.0, %v2722_v1 }
 0xe18   : > { %v3874_v8 = vpop.f32.mrf.mxu0 }
 0xe19   : > { %v2556_v9 = vsel %vm1255_vm3, %v2551_v39, -inf }
 0xe1a   : > { %2557 = vmax.xlane.f32.xlu0 %v2556_v9  ;;  %v2553_v11 = vpop.f32.mrf.mxu0 }
 0xe1c   : > { %v3875_v13 = vpop.f32.mrf.mxu0 }
 0xe1e   : > { %v2658_v12 = vpop.f32.mrf.mxu0 }
 0xe1f   : > { %v2659_v14 = vadd.f32 %v2658_v12, %v2293_v35 }
 0xe20   : > { %v3886_v15 = vpop.f32.mrf.mxu0 }
 0xe21   : > { %v2664_v16 = vsel %vm1255_vm3, %v2659_v14, -inf }
 0xe22   : > { %2665 = vmax.xlane.f32.xlu0 %v2664_v16  ;;  %v2661_v17 = vpop.f32.mrf.mxu0 }
 0xe24   : > { %v3887_v19 = vpop.f32.mrf.mxu0 }
 0xe26   : > { %v5314_v30 = vpop.f32.mrf.mxu0 }
 0xe28   : > { %v2342_v20 = vpop.xlane.xlu1 %2341  ;;  %v3898_v6 = vpop.f32.mrf.mxu0 }
 0xe29   : > { %v2343_v22 = vsub.f32 %v2335_v52, %v2342_v20 }
 0xe2a   : > { %v2771_v23 = vpop.f32.mrf.mxu0 }
 0xe2b   : > { %v2344_v24 = vmul.f32 1.442695, %v2343_v22 }
 0xe2c   : > { %v3899_v43 = vpop.f32.mrf.mxu0 }
 0xe2d   : > { %4144 = vpow2.f32 %v2344_v24  ;;  %v2784_v24 = vld [vmem:[#allocation12 + $0x4] sm:$0xf] }
 0xe2e   : > { %v5316_v26 = vpop.f32.mrf.mxu0 }
 0xe30   : > { %v3910_v27 = vpop.f32.mrf.mxu0 }
 0xe31   : > { %v1872_v27 = vadd.f32 %v5174_v36, %v5195_v61 }
 0xe32   : > { %v2879_v28 = vpop.f32.mrf.mxu0 }
 0xe34   : > { %v3911_v29 = vpop.f32.mrf.mxu0 }
 0xe35   : > { %v2789_v29 = vsel %vm2730_vm4, %v2784_v24, 0 }
 0xe3a   : > { %v4145_v18 = vpop.eup %4144 }
 0xe3b   : > { %v2346_v32 = vsel %vm1255_vm3, %v4145_v18, 0.0 }
 0xe3c   : > { %2347 = vadd.xlane.f32.xlu0 %v2346_v32  ;;  %v2886_v32 = vld [vmem:[#allocation12 + $0xc] sm:$0xf] }
 0xe62   : > { %v5319_v31 = vpop.f32.mrf.mxu1 }
 0xe64   : > { %v3828_v33 = vpop.f32.mrf.mxu1 }
 0xe66   : > { %v2172_v34 = vpop.f32.mrf.mxu1 }
 0xe67   : > { %v2170_v34 = vadd.f32 %v5319_v31, %v5252_v3  ;;  %v3069_v31 = vld [vmem:[#allocation12 + $0x18] sm:$0xf] }
 0xe68   : > { %v3829_v37 = vpop.f32.mrf.mxu1 }
 0xe69   : > { %v2891_v37 = vsel %vm2730_vm4, %v2886_v32, 0  ;;  %v2883_v36 = vmul.f32 0.5, %v2170_v34 }
 0xe6a   : > { %v2285_v38 = vpop.f32.mrf.mxu1 }
 0xe6b   : > { %v2884_v61 = vpack.c.bf16 %v2883_v36, %v2883_v36 }
 0xe6c   : > { %v3844_v40 = vpop.f32.mrf.mxu1 }
 0xe6e   : > { %v2288_v42 = vpop.f32.mrf.mxu1 }
 0xe6f   : > { %v2292_v44 = vpack.c.bf16 %v2288_v42, %v2285_v38  ;;  %v3019_v38 = vld [vmem:[#allocation12 + $0x14] sm:$0xf] }
 0xe70   : > { %v3845_v10 = vpop.f32.mrf.mxu1  ;;  %v3024_v3 = vsel %vm2730_vm4, %v3019_v38, 0 }
 0xe71   : > { %3853 = vmatpush3.bf16.msra.mxu1 %v2292_v44  ;;  %2460 = vrot.lane.b32.xlu1 %v2292_v44, %s4594_s8 }
 0xe72   : > { %3864 = vmatprep.subr.bf16.mxu1 %v4591_v0 }
 0xe75   : > { %2676 = vrot.lane.b32.xlu1 %v2292_v44, %s4596_s26  ;;  %s5560_s26 = sld [smem:[#allocation45_spill]] }
 0xe7b   : > { %s5561_s10 = smov %s5560_s26 }
 0xe9b   : > { %v2449_v45 = vpop.xlane.xlu0 %2448 }
 0xe9c   : > { %v2450_v46 = vsub.f32 %v2442_v63, %v2449_v45  ;;  %v2968_v63 = vsel %vm2730_vm4, %v2963_v62, 0 }
 0xe9d   : > { %3919 = vmatpush3.bf16.msra.mxu0 %v2968_v63 }
 0xe9e   : > { %v2451_v47 = vmul.f32 1.442695, %v2450_v46  ;;  %3930 = vmatprep.subr.bf16.mxu0 %v4591_v0 }
 0xea0   : > { %4146 = vpow2.f32 %v2451_v47  ;;  %v3563_v47 = vld [vmem:[%s5559_s13 + $0x1] sm:$0x1] }
 0xea3   : > { %v2558_v48 = vpop.xlane.xlu0 %2557 }
 0xea4   : > { %v2559_v21 = vsub.f32 %v2551_v39, %v2558_v48  ;;  %v5337_v39 = vsub.s32 0, %v2936_v5 }
 0xea6   : > { %v2560_v59 = vmul.f32 1.442695, %v2559_v21  ;;  %v2938_v8 = vrot.slane %v2722_v1, %v5337_v39  ;;  %v2949_v9 = vrot.slane %v2944_v7, %v5337_v39  ;;  %v3171_v48 = vrot.slane %v3563_v47, %v5337_v39  ;;  %v3559_v1 = vld [vmem:[%s5560_s26] ss:$0 sm:$0xff] }
 0xea7   : > { %v3177_v21 = vsub.f32 1.0, %v3563_v47  ;;  %v2780_v4 = vadd.f32 %v3559_v1, %v5314_v30 }
 0xea8   : > { %4148 = vpow2.f32 %v2560_v59  ;;  %2940 = vperm.xlu1 %4090, %v2938_v8  }
 0xea9   : > { %v3182_v59 = vrot.slane %v3177_v21, %v5337_v39 }
 0xeab   : > { %v2666_v50 = vpop.xlane.xlu0 %2665 }
 0xeac   : > { %v2667_v41 = vsub.f32 %v2659_v14, %v2666_v50  ;;  %3173 = vperm.xlu1 %4090, %v3171_v48   ;;  %v3119_v50 = vld [vmem:[#allocation12 + $0x1c] sm:$0xf] }
 0xead   : > { %v4147_v35 = vpop.eup %4146 }
 0xeae   : > { %v2668_v51 = vmul.f32 1.442695, %v2667_v41  ;;  %v2453_v52 = vsel %vm1255_vm3, %v4147_v35, 0.0 }
 0xeaf   : > { %2454 = vadd.xlane.f32.xlu0 %v2453_v52 }
 0xeb0   : > { %4150 = vpow2.f32 %v2668_v51  ;;  %3184 = vperm.xlu1 %4090, %v3182_v59   ;;  %v3124_v51 = vsel %vm2730_vm4, %v3119_v50, 0 }
 0xeb5   : > { %v4149_v53 = vpop.eup %4148 }
 0xeb6   : > { %v2562_v54 = vsel %vm1255_vm3, %v4149_v53, 0.0 }
 0xeb7   : > { %2563 = vadd.xlane.f32.xlu0 %v2562_v54 }
 0xebd   : > { %v4151_v55 = vpop.eup %4150 }
 0xebe   : > { %v2670_v56 = vsel %vm1255_vm3, %v4151_v55, 0.0 }
 0xebf   : > { %2671 = vadd.xlane.f32.xlu0 %v2670_v56 }
 0xec5   : > { %v2348_v57 = vpop.xlane.xlu0 %2347 }
 0xec6   : > { %4152 = vrcp.f32 %v2348_v57 }
 0xed3   : > { %v4153_v25 = vpop.eup %4152 }
 0xed4   : > { %v2350_v60 = vmul.f32 %v4153_v25, %v4145_v18  ;;  %v2781_v18 = vmul.f32 0.5, %v1872_v27 }
 0xed5   : > { %2568 = vrot.lane.b32.xlu0 %v2292_v44, %s4595_s20  ;;  %v3074_v44 = vsel %vm2730_vm4, %v3069_v31, 0 }
 0xed6   : > { %v2351_v49 = vpack.c.bf16 %v2350_v60, %v2350_v60  ;;  %v2782_v33 = vpack.c.bf16 %v2781_v18, %v2781_v18 }
 0xed8   : > { %3855 = vmatmul.mubr.msk.bf16.vlgmr.msra.gmra.mxu1 %vm1255_vm3, %v2351_v49 }
 0xed9   : > { %3866 = vmatprep.mubr.msk.bf16.mxu1 %vm4592_vm0, %v4591_v0  ;;  %2951 = vperm.xlu0 %4091, %v2949_v9  }
 0xee3   : > { %v2461_v58 = vpop.permute.xlu1 %2460 }
 0xee4   : > { %3865 = vmatpush3.bf16.msra.mxu1 %v2461_v58 }
 0xee5   : > { %3876 = vmatprep.subr.bf16.mxu1 %v4591_v0 }
 0xee7   : > { %v2677_v22 = vpop.permute.xlu1 %2676 }
 0xf38   : > { %v2455_v11 = vpop.xlane.xlu0 %2454 }
 0xf39   : > { %4154 = vrcp.f32 %v2455_v11 }
 0xf40   : > { %v2564_v13 = vpop.xlane.xlu0 %2563 }
 0xf41   : > { %4156 = vrcp.f32 %v2564_v13 }
 0xf46   : > { %v4155_v12 = vpop.eup %4154 }
 0xf47   : > { %v2457_v14 = vmul.f32 %v4155_v12, %v4147_v35  ;;  %v2941_v12 = vpop.permute.xlu1 %2940 }
 0xf48   : > { %v2672_v15 = vpop.xlane.xlu0 %2671 }
 0xf49   : > { %4158 = vrcp.f32 %v2672_v15  ;;  %v2458_v16 = vpack.c.bf16 %v2457_v14, %v2457_v14  ;;  %v4160_v15 = vld [vmem:[%s670_s1] sm:$0xff]  ;;  %s5563_s1 = sld [smem:[#allocation48_spill]] }
 0xf4b   : > { %3867 = vmatmul.mubr.msk.bf16.vlgmr.msra.gmra.mxu1 %vm1255_vm3, %v2458_v16 }
 0xf4c   : > { %v2569_v17 = vpop.permute.xlu0 %2568  ;;  %3878 = vmatprep.mubr.msk.bf16.mxu1 %vm4592_vm0, %v4591_v0 }
 0xf4d   : > { %3877 = vmatpush3.bf16.msra.mxu1 %v2569_v17 }
 0xf4e   : > { %v4157_v19 = vpop.eup %4156  ;;  %3888 = vmatprep.subr.bf16.mxu1 %v4591_v0 }
 0xf4f   : > { %v2566_v20 = vmul.f32 %v4157_v19, %v4149_v53  ;;  %s3207_s16 = scalar_lea.hbm %s5563_s1, %s3572_s19 }
 0xf51   : > { %v2567_v6 = vpack.c.bf16 %v2566_v20, %v2566_v20 }
 0xf53   : > { %3879 = vmatmul.mubr.msk.bf16.vlgmr.msra.gmra.mxu1 %vm1255_vm3, %v2567_v6 }
 0xf54   : > { %3889 = vmatpush3.bf16.msra.mxu1 %v2677_v22  ;;  %3890 = vmatprep.mubr.msk.bf16.mxu1 %vm4592_vm0, %v4591_v0  ;;  %v2952_v9 = vpop.permute.xlu0 %2951 }
 0xf55   : > { %3900 = vmatprep.subr.bf16.mxu1 %v4591_v0  ;;  %v2954_v16 = vmul.f32 %v4160_v15, %v2952_v9 }
 0xf56   : > { %v4159_v23 = vpop.eup %4158 }
 0xf57   : > { %v2674_v43 = vmul.f32 %v4159_v23, %v4151_v55 }
 0xf59   : > { %v2675_v28 = vpack.c.bf16 %v2674_v43, %v2674_v43 }
 0xf5b   : > { %3891 = vmatmul.mubr.msk.bf16.vlgmr.msra.gmra.mxu1 %vm1255_vm3, %v2675_v28 }
 0xf5c   : > { %3901 = vmatpush3.bf16.msra.mxu1 %v2789_v29  ;;  %3902 = vmatprep.mubr.msk.bf16.mxu1 %vm4592_vm0, %v4591_v0 }
 0xf5d   : > { %3912 = vmatprep.subr.bf16.mxu1 %v4591_v0 }
 0xf63   : > { %3903 = vmatmul.mubr.msk.bf16.vlgmr.msra.gmra.mxu1 %vm1208_vm2, %v2782_v33 }
 0xf64   : > { %3913 = vmatpush3.bf16.msra.mxu1 %v2891_v37  ;;  %3914 = vmatprep.mubr.msk.bf16.mxu1 %vm4592_vm0, %v4591_v0 }
 0xf65   : > { %3924 = vmatprep.subr.bf16.mxu1 %v4591_v0 }
 0xf6b   : > { %3915 = vmatmul.mubr.msk.bf16.vlgmr.msra.gmra.mxu1 %vm1208_vm2, %v2884_v61 }
 0xf6c   : > { %3926 = vmatprep.mubr.msk.bf16.mxu1 %vm4592_vm0, %v4591_v0  ;;  %3925 = vmatpush3.bf16.msra.mxu1 %v3024_v3 }
 0xf6d   : > { %3936 = vmatprep.subr.bf16.mxu1 %v4591_v0 }
 0xf98   : > { %v2389_v40 = vpop.f32.mrf.mxu1 }
 0xf99   : > { %v2961_v42 = vpack.c.bf16 %v2389_v40, %v2389_v40 }
 0xf9a   : > { %v3856_v10 = vpop.f32.mrf.mxu1 }
 0xf9b   : > { %3921 = vmatmul.mubr.msk.bf16.vlgmr.msra.gmra.mxu0 %vm1208_vm2, %v2961_v42 }
 0xf9c   : > { %v2392_v45 = vpop.f32.mrf.mxu1  ;;  %3931 = vmatpush3.bf16.msra.mxu0 %v3074_v44  ;;  %3932 = vmatprep.mubr.msk.bf16.mxu0 %vm4592_vm0, %v4591_v0 }
 0xf9e   : > { %v3857_v46 = vpop.f32.mrf.mxu1 }
0x100b   : > { %v2500_v41 = vpop.f32.mrf.mxu1 }
0x100c   : > { %v3017_v35 = vpack.c.bf16 %v2500_v41, %v2500_v41 }
0x100d   : > { %v3868_v52 = vpop.f32.mrf.mxu1 }
0x100e   : > { %3927 = vmatmul.mubr.msk.bf16.vlgmr.msra.gmra.mxu1 %vm1208_vm2, %v3017_v35 }
0x100f   : > { %v2503_v53 = vpop.f32.mrf.mxu1  ;;  %3937 = vmatpush3.bf16.msra.mxu1 %v3124_v51  ;;  %3938 = vmatprep.mubr.msk.bf16.mxu1 %vm4592_vm0, %v4591_v0 }
0x1011   : > { %v3869_v54 = vpop.f32.mrf.mxu1 }
0x1013   : > { %v2608_v55 = vpop.f32.mrf.mxu1 }
0x1014   : > { %v3067_v56 = vpack.c.bf16 %v2608_v55, %v2608_v55 }
0x1015   : > { %v3880_v57 = vpop.f32.mrf.mxu1 }
0x1016   : > { %3933 = vmatmul.mubr.msk.bf16.vlgmr.msra.gmra.mxu0 %vm1208_vm2, %v3067_v56 }
0x1017   : > { %v2611_v25 = vpop.f32.mrf.mxu1 }
0x1019   : > { %v3881_v60 = vpop.f32.mrf.mxu1 }
0x101b   : > { %v2716_v49 = vpop.f32.mrf.mxu1 }
0x101c   : > { %v3117_v58 = vpack.c.bf16 %v2716_v49, %v2716_v49 }
0x101d   : > { %v3892_v62 = vpop.f32.mrf.mxu1 }
0x101e   : > { %3939 = vmatmul.mubr.msk.bf16.vlgmr.msra.gmra.mxu1 %vm1208_vm2, %v3117_v58 }
0x101f   : > { %v2719_v63 = vpop.f32.mrf.mxu1 }
0x1021   : > { %v3893_v0 = vpop.f32.mrf.mxu1 }
0x1023   : > { %v2825_v2 = vpop.f32.mrf.mxu1 }
0x1024   : > { %v2831_v7 = vadd.f32 %v2825_v2, %v2780_v4 }
0x1025   : > { %v3904_v5 = vpop.f32.mrf.mxu1 }
0x1026   : > { %v2882_v11 = vadd.f32 %v5316_v26, %v2831_v7 }
0x1027   : > { %v2828_v39 = vpop.f32.mrf.mxu1 }
0x1029   : > { %v3905_v8 = vpop.f32.mrf.mxu1 }
0x102b   : > { %v2927_v13 = vpop.f32.mrf.mxu1 }
0x102c   : > { %v2933_v14 = vadd.f32 %v2927_v13, %v2882_v11 }
0x102d   : > { %v3916_v17 = vpop.f32.mrf.mxu1 }
0x102e   : > { %v2943_v19 = vmul.f32 %v2941_v12, %v2933_v14 }
0x102f   : > { %v2930_v30 = vpop.f32.mrf.mxu1 }
0x1030   : > { %v2955_v20 = vadd.f32 %v2954_v16, %v2943_v19 }
0x1031   : > { %v3917_v6 = vpop.f32.mrf.mxu1 }
0x1032   : > { %2956 = vst.msk [vmem:[%s784_s6] sm:$0xff] %vm824_vm1, %v2955_v20 }
0x105b   : > { %v3004_v22 = vpop.f32.mrf.mxu0 }
0x105d   : > { %v3922_v26 = vpop.f32.mrf.mxu0 }
0x105f   : > { %v3007_v23 = vpop.f32.mrf.mxu0 }
0x1061   : > { %v3923_v24 = vpop.f32.mrf.mxu0 }
0x1062   : > { %4469 = shalt.err (!%p4466_p2)
}
0x1063   : > { %s4470_s8 = scalar_lea.hbm %s3207_s16, 128  ;;  %s4474_s6 = scalar_lea.hbm %s5563_s1, 256 }
0x1064   : > { %p4471_p6 = scmp.ne.s32.totalorder %s3207_s16, %s4470_s8  ;;  %p4475_p11 = scmp.lt.s32.totalorder %s3207_s16, %s5563_s1 }
0x1065   : > { %p4476_p10 = scmp.lt.s32.totalorder %s4474_s6, %s4470_s8 }
0x1066   : > { %p4472_p7 = pnand %p4471_p6, %p5564_p5 }
0x1067   : > { %p4477_p1 = por %p4476_p10, %p4475_p11 }
0x1068   : > { %p4473_p4 = pneg %p4472_p7 }
0x106a   : > { %p4478_p13 = pnand %p4477_p1, %p4473_p4 }
0x106c   : > { %4481 = shalt.err (!%p4478_p13)
}
0x106d   : > { %3978 = dma.vmem_to_hbm [thread:$0]  (%p5564_p5), %s3210_s28, 128, %s3207_s16, %s3191_s24   ;;  %v3566_v18 = vld [vmem:[%s5561_s10 + $0x1] ss:$0 sm:$0xff]  ;;  %v3174_v33 = vpop.permute.xlu1 %3173 }
0x106e   : > { %v3016_v37 = vadd.f32 %v3566_v18, %v3004_v22  ;;  %s791_s16 = scalar_lea.vmem [#allocation20], %s4972_s30  ;;  %v4161_v10 = vld [vmem:[%s679_s17] sm:$0xff]  ;;  %s5565_s23 = sld [smem:[#allocation49_spill]] }
0x106f   : > { %s3222_s28 = sshll.u32 %s791_s16, 4  ;;  %s3196_s20 = scalar_lea.sflag [#allocation21], %s4969_s2  ;;  %s3223_s28 = int_to_ptr.vmem [resolvable:$true] %s3222_s28 }
0x1070   : > { %s4482_s26 = scalar_lea.vmem %s3223_s28, 128  ;;  %s4599_s30 = smov [#allocation20]  }
0x1071   : > { %v3185_v31 = vpop.permute.xlu1 %3184  ;;  %p4483_p0 = scmp.ne.s32.totalorder %s3223_s28, %s4482_s26  ;;  %s4486_s17 = sshll.u32 %s4599_s30, 4  ;;  %s4487_s17 = int_to_ptr.vmem [resolvable:$false] %s4486_s17 }
0x1072   : > { %v3187_v45 = vmul.f32 %v4161_v10, %v3185_v31  ;;  %s4488_s6 = scalar_lea.vmem %s4487_s17, 256  ;;  %p4489_p9 = scmp.lt.s32.totalorder %s3223_s28, %s4487_s17 }
0x1073   : > { %p4484_p3 = pnand %p4483_p0, %p5564_p5  ;;  %p4490_p12 = scmp.lt.s32.totalorder %s4488_s6, %s4482_s26 }
0x1074   : > { %s5422_s8 = scalar_lea.hbm %s5565_s23, %s3572_s19 }
0x1075   : > { %p4485_p8 = pneg %p4484_p3  ;;  %p4491_p2 = por %p4490_p12, %p4489_p9 }
0x1077   : > { %p4492_p6 = pnand %p4491_p2, %p4485_p8 }
0x10ce   : > { %v3060_v43 = vpop.f32.mrf.mxu1 }
0x10cf   : > { %v3066_v61 = vadd.f32 %v3060_v43, %v3016_v37 }
0x10d0   : > { %v3928_v27 = vpop.f32.mrf.mxu1 }
0x10d2   : > { %v3063_v28 = vpop.f32.mrf.mxu1 }
0x10d4   : > { %v3929_v29 = vpop.f32.mrf.mxu1 }
0x10d6   : > { %v3110_v32 = vpop.f32.mrf.mxu0 }
0x10d7   : > { %v3116_v3 = vadd.f32 %v3110_v32, %v3066_v61 }
0x10d8   : > { %v3934_v34 = vpop.f32.mrf.mxu0 }
0x10da   : > { %v3113_v36 = vpop.f32.mrf.mxu0 }
0x10dc   : > { %v3935_v38 = vpop.f32.mrf.mxu0 }
0x10de   : > { %v3160_v40 = vpop.f32.mrf.mxu1 }
0x10df   : > { %v3166_v42 = vadd.f32 %v3160_v40, %v3116_v3 }
0x10e0   : > { %v3940_v44 = vpop.f32.mrf.mxu1 }
0x10e1   : > { %v3176_v46 = vmul.f32 %v3174_v33, %v3166_v42 }
0x10e2   : > { %v3163_v47 = vpop.f32.mrf.mxu1 }
0x10e3   : > { %v3188_v48 = vadd.f32 %v3187_v45, %v3176_v46 }
0x10e4   : > { %v3941_v21 = vpop.f32.mrf.mxu1 }
0x10e5   : > { %3189 = vst.msk [vmem:[%s791_s16] sm:$0xff] %vm824_vm1, %v3188_v48 }
0x10e6   : > { %4495 = shalt.err (!%p4492_p6)
}
0x10e7   : > { %s4496_s0 = scalar_lea.hbm %s5422_s8, 128  ;;  %s4500_s7 = scalar_lea.hbm %s5565_s23, 256 }
0x10e8   : > { %p4497_p7 = scmp.ne.s32.totalorder %s5422_s8, %s4496_s0  ;;  %p4501_p10 = scmp.lt.s32.totalorder %s5422_s8, %s5565_s23 }
0x10e9   : > { %p4502_p1 = scmp.lt.s32.totalorder %s4500_s7, %s4496_s0 }
0x10ea   : > { %p4498_p4 = pnand %p4497_p7, %p5564_p5 }
0x10eb   : > { %p4503_p13 = por %p4502_p1, %p4501_p10 }
0x10ec   : > { %p4499_p11 = pneg %p4498_p4 }
0x10ee   : > { %p4504_p0 = pnand %p4503_p13, %p4499_p11 }
0x10f0   : > { %4507 = shalt.err (!%p4504_p0)
}
0x10f1   : > { %3979 = dma.vmem_to_hbm [thread:$0]  (%p5564_p5), %s3223_s28, 128, %s5422_s8, %s3196_s20  }
0x10f2 PF: > { %s5566_s22 = sld [smem:[#allocation31_spill]]  ;;  %p5569_p8 = scmp.ge.s32.totalorder %s4574_s27, 2 }
0x10f3   : > { %s5567_s16 = sld [smem:[#allocation36_spill]] }
0x10f8   : > { %s3234_s24 = sand.u32 1, %s5566_s22  }
0x10f9   : > { %p5568_p3 = scmp.ne.s32.totalorder %s5567_s16, 0  ;;  %s3235_s18 = scalar_lea.sflag [#allocation4], %s3234_s24 }
0x10fb   : > { %p4018_p9 = pnand %p5569_p8, %p5568_p3 }
0x10fd   : > { %p4019_p12 = pneg %p4018_p9 }
0x10ff   : > { %4553 = dma.done.wait (%p4019_p12), %s3235_s18, 128  }
0x1100   : > { %4555 = vsyncadd (%p4019_p12), %s3235_s18, 4294967168  ;;  %s3244_s26 = scalar_lea.sflag [#allocation21], %s3234_s24 }
0x1101   : > { %4557 = dma.done.wait (%p4019_p12), %s3244_s26, 128  }
0x1102   : > { %4559 = vsyncadd (%p4019_p12), %s3244_s26, 4294967168  ;;  %s5570_s27 = sld [smem:[#allocation33_spill]]  ;;  %s5573_s24 = smov %s4566_s25 }
0x1103   : > { %s5571_s21 = sld [smem:[#allocation32_spill]] }
0x1104   : > { %s5572_s26 = sld [smem:[#allocation34_spill]] }
0x1108   : > { %p38_p5 = scmp.ge.s32.totalorder %s5570_s27, 4  }
0x1109   : > { %s5574_s25 = smov %s5571_s21 }
0x110a   :  { %40 = sbr.rel (!%p38_p5) target bundleno = 25 (0x19), region = 228 }
0x110f   :  { %3249 = vsyncpa [#allocation3], 1 }
0x1110   :  { %3251 = vsyncpa [#allocation3 + $0x1], 1 }
0x1111   :  { %3252 = vsyncpa [#allocation6], 1 }
0x1112   :  { %3253 = vsyncpa [#allocation11], 1 }
0x1113   :  { %3254 = vsyncpa [#allocation14], 1 }
0x1114   :  { %3255 = vsyncpa [#allocation17], 1 }
0x1115   :  { %3257 = vsyncpa [#allocation17 + $0x1], 1 }
0x1116   :  { %3258 = vsyncpa [#allocation4], 1 }
0x1117   :  { %3260 = vsyncpa [#allocation4 + $0x1], 1 }
0x1118   :  { %3261 = vsyncpa [#allocation21], 1 }
0x1119   :  { %3263 = vsyncpa [#allocation21 + $0x1], 1 }

</bundles_post_ra>
